<compile_context>
chip_gen: v6e
topology: v6e:2x2x1
jax: 0.10.0
libtpu: 0.0.40
codegen_flags: <defaults>
</compile_context>

<pallas_src>
import functools
import numpy as np
import jax
import jax.numpy as jnp
from jax import lax
from jax.experimental import pallas as pl
from jax.experimental.pallas import tpu as pltpu


def _round_up(x, m):
    return ((x + m - 1) // m) * m


# --------------------------- recurrent kernel ------------------------------
def _lstm_recurrent_kernel(bs_ref,                        # SMEM (Tp,) int32 (prefetch)
                           x_ref, wih_ref, whh_ref, b_ref,  # VMEM inputs
                           out_ref, hT_ref, cT_ref,          # VMEM outputs
                           gates_sc, h_sc, c_sc,             # VMEM scratch
                           *, hp, bp, t_blk, unroll):
    tb = pl.program_id(0)

    @pl.when(tb == 0)
    def _():
        h_sc[...] = jnp.zeros_like(h_sc)
        c_sc[...] = jnp.zeros_like(c_sc)

    # Fused input projection for the whole time block (one large MXU matmul):
    #   (t_blk*Bp, I) @ (I, 4Hp) + bias  ->  f32 gates scratch in VMEM.
    w_in = wih_ref[...]
    gates_sc[...] = (jnp.dot(x_ref[...].astype(w_in.dtype), w_in,
                             preferred_element_type=jnp.float32)
                     + b_ref[...])

    w = whh_ref[...]                                        # (Hp, 4Hp), constant block
    row_ids = lax.broadcasted_iota(jnp.int32, (bp, hp), 0)  # hoisted out of loop

    def sig(z):                                             # sigmoid via one EUP tanh
        return 0.5 * jnp.tanh(0.5 * z) + 0.5

    def step(j, carry):
        h, c = carry                                        # f32 (Bp, Hp)
        n = bs_ref[tb * t_blk + j]                          # active rows this timestep

        off = pl.multiple_of(j * bp, bp)                    # sublane-aligned dynamic slice
        g = gates_sc[pl.ds(off, bp), :] + jnp.dot(h.astype(w.dtype), w,
                                                  preferred_element_type=jnp.float32)

        i_g = sig(g[:, 0 * hp:1 * hp])                      # lane-aligned static slices
        f_g = sig(g[:, 1 * hp:2 * hp])
        g_g = jnp.tanh(g[:, 2 * hp:3 * hp])
        o_g = sig(g[:, 3 * hp:4 * hp])

        c_new = f_g * c + i_g * g_g
        h_new = o_g * jnp.tanh(c_new)

        # store unmasked: rows >= n are never gathered during unpacking
        out_ref[j] = h_new.astype(out_ref.dtype)

        active = row_ids < n
        return jnp.where(active, h_new, h), jnp.where(active, c_new, c)

    h_fin, c_fin = lax.fori_loop(0, t_blk, step, (h_sc[...], c_sc[...]),
                                 unroll=unroll)
    h_sc[...] = h_fin
    c_sc[...] = c_fin

    @pl.when(tb == pl.num_programs(0) - 1)
    def _():
        hT_ref[...] = h_fin.astype(hT_ref.dtype)
        cT_ref[...] = c_fin.astype(cT_ref.dtype)


# ------------------------------ wrapper -------------------------------------
def lstm_layer_forward(packed_input, batch_sizes, w_ih, w_hh, b_ih, b_hh,
                       hidden_size, go_forward=True, *,
                       t_blk=None, weight_dtype=jnp.float32,
                       vmem_budget_bytes=40 << 20):
    """Pallas implementation of LSTMLayer.forward (eval mode).

    packed_input : (total, input_size)   (PackedSequence.data)
    batch_sizes  : host int array (T,)   (PackedSequence.batch_sizes)
    weight_dtype : f32 (default, parity with PyTorch) or bf16 (MXU fast path).
    returns (packed_output (total, H), (h_final (B,H), c_final (B,H)))
    """
    bs = np.asarray(batch_sizes, dtype=np.int64)
    T = int(bs.shape[0])
    B = int(bs[0])
    total, I = packed_input.shape
    H = int(hidden_size)
    dtype = packed_input.dtype

    # padded sizes: lane-aligned hidden, sublane-aligned batch
    Hp = _round_up(max(H, 1), 128)
    Bp = _round_up(max(B, 1), 8)

    # ---- t_blk from a cross-generation VMEM budget (v7x: 64 MiB physical) ----
    wbytes = jnp.dtype(weight_dtype).itemsize
    fixed = (2 * (I + Hp) * 4 * Hp * wbytes       # double-buffered W_ih, W_hh
             + 2 * 4 * Hp * 4                     # bias
             + 6 * Bp * Hp * 4)                   # h/c scratch + hT/cT outputs
    per_t = Bp * (2 * I * 4 + 2 * Hp * 4 + 4 * Hp * 4)   # x blk + out blk (dbl-buf) + gates scratch
    if t_blk is None:
        t_blk = (vmem_budget_bytes - fixed) // per_t
    t_blk = int(max(1, min(t_blk, 32, T)))
    Tp = _round_up(T, t_blk)

    # ---- packed -> dense glue: one scatter with host-precomputed flat indices ----
    cum = np.concatenate([[0], np.cumsum(bs)])
    t_idx = np.repeat(np.arange(T, dtype=np.int64), bs)                 # (total,)
    r_idx = np.arange(total, dtype=np.int64) - np.repeat(cum[:-1], bs)  # (total,)
    # reverse direction handled purely by remapping timesteps to kernel steps
    kt_idx = t_idx if go_forward else (Tp - 1 - t_idx)
    flat_idx = (kt_idx * Bp + r_idx).astype(np.int32)

    x_flat = jnp.zeros((Tp * Bp, I), jnp.float32)
    x_flat = x_flat.at[flat_idx].set(packed_input.astype(jnp.float32))

    bs_k = np.zeros((Tp,), np.int32)
    bs_k[:T] = bs
    if not go_forward:
        bs_k = bs_k[::-1].copy()

    # ---- parameters: gate-aware padding to Hp ----
    def pad_gate_cols(a):                 # (..., 4H) -> (..., 4Hp)
        a = a.reshape(a.shape[:-1] + (4, H))
        a = jnp.pad(a, [(0, 0)] * (a.ndim - 1) + [(0, Hp - H)])
        return a.reshape(a.shape[:-2] + (4 * Hp,))

    wih_p = pad_gate_cols(jnp.asarray(w_ih, jnp.float32).T).astype(weight_dtype)   # (I, 4Hp)
    whh_p = jnp.pad(jnp.asarray(w_hh, jnp.float32).T, ((0, Hp - H), (0, 0)))
    whh_p = pad_gate_cols(whh_p).astype(weight_dtype)                               # (Hp, 4Hp)
    bias_p = pad_gate_cols(jnp.asarray(b_ih, jnp.float32)
                           + jnp.asarray(b_hh, jnp.float32))[None, :]               # (1, 4Hp) f32

    # ---- unroll decoupled from t_blk to bound vreg pressure ----
    gate_elems = Bp * 4 * Hp
    if gate_elems <= 8192:
        unroll = t_blk
    elif gate_elems <= 32768:
        unroll = min(t_blk, 4)
    else:
        unroll = min(t_blk, 2)

    kernel = functools.partial(_lstm_recurrent_kernel, hp=Hp, bp=Bp,
                               t_blk=t_blk, unroll=unroll)

    out_dense, h_fin, c_fin = pl.pallas_call(
        kernel,
        out_shape=(jax.ShapeDtypeStruct((Tp, Bp, Hp), jnp.float32),
                   jax.ShapeDtypeStruct((Bp, Hp), jnp.float32),
                   jax.ShapeDtypeStruct((Bp, Hp), jnp.float32)),
        grid_spec=pltpu.PrefetchScalarGridSpec(
            num_scalar_prefetch=1,                     # batch_sizes -> SMEM
            grid=(Tp // t_blk,),
            in_specs=[
                pl.BlockSpec((t_blk * Bp, I), lambda tb, bs: (tb, 0)),   # x block
                pl.BlockSpec((I, 4 * Hp), lambda tb, bs: (0, 0)),        # W_ih (constant)
                pl.BlockSpec((Hp, 4 * Hp), lambda tb, bs: (0, 0)),       # W_hh (constant)
                pl.BlockSpec((1, 4 * Hp), lambda tb, bs: (0, 0)),        # bias (constant)
            ],
            out_specs=[
                pl.BlockSpec((t_blk, Bp, Hp), lambda tb, bs: (tb, 0, 0)),
                pl.BlockSpec((Bp, Hp), lambda tb, bs: (0, 0)),
                pl.BlockSpec((Bp, Hp), lambda tb, bs: (0, 0)),
            ],
            scratch_shapes=[
                pltpu.VMEM((t_blk * Bp, 4 * Hp), jnp.float32),  # block gates (fused XW)
                pltpu.VMEM((Bp, Hp), jnp.float32),              # h state
                pltpu.VMEM((Bp, Hp), jnp.float32),              # c state
            ],
        ),
        compiler_params=pltpu.CompilerParams(
            dimension_semantics=("arbitrary",),        # time recurrence is serial
            vmem_limit_bytes=48 * 1024 * 1024),        # safe under v7x's 64 MiB
    )(jnp.asarray(bs_k, jnp.int32), x_flat, wih_p, whh_p, bias_p)

    # ---- dense -> packed glue: one gather with the same flat indices ----
    packed_output = out_dense[kt_idx, r_idx][:, :H].astype(dtype)
    h_final = h_fin[:B, :H].astype(dtype)
    c_final = c_fin[:B, :H].astype(dtype)
    return packed_output, (h_final, c_final)


# ---------------- pure-numpy reference (mirrors the PyTorch code) -----------
def ref_forward(packed, batch_sizes, w_ih, w_hh, b_ih, b_hh, hidden_size, go_forward):
    x = np.asarray(packed, np.float32)
    bs = np.asarray(batch_sizes, np.int64)
    seq_len = len(bs)
    B = int(bs[0])
    H = hidden_size
    output = np.zeros((x.shape[0], H), np.float32)
    h = np.zeros((B, H), np.float32)
    c = np.zeros((B, H), np.float32)
    cum = np.cumsum(bs)
    sig = lambda z: 1.0 / (1.0 + np.exp(-z))
    for step in range(seq_len):
        t = step if go_forward else seq_len - step - 1
        n = int(bs[t])
        begin, end = int(cum[t]) - n, int(cum[t])
        xt = x[begin:end]
        gates = xt @ np.asarray(w_ih).T + h[:n] @ np.asarray(w_hh).T \
            + np.asarray(b_ih) + np.asarray(b_hh)
        i_g = sig(gates[:, 0 * H:1 * H])
        f_g = sig(gates[:, 1 * H:2 * H])
        g_g = np.tanh(gates[:, 2 * H:3 * H])
        o_g = sig(gates[:, 3 * H:4 * H])
        c_new = f_g * c[:n] + i_g * g_g
        h_new = o_g * np.tanh(c_new)
        output[begin:end] = h_new
        h = h.copy(); c = c.copy()
        h[:n] = h_new; c[:n] = c_new
    return output, h, c


if __name__ == "__main__":
    key = jax.random.PRNGKey(0)
    input_size, hidden_size = 32, 32
    lengths = [8, 6, 5, 3]                    # sorted descending (pack_padded_sequence)
    seq_len = max(lengths)
    batch_sizes = np.array([sum(1 for L in lengths if L > t) for t in range(seq_len)],
                           np.int64)          # [4,4,4,3,3,2,1,1]
    total = int(batch_sizes.sum())

    k1, k2, k3, k4, k5 = jax.random.split(key, 5)
    bound = 1.0 / np.sqrt(hidden_size)        # PyTorch LSTMCell init range
    w_ih = jax.random.uniform(k1, (4 * hidden_size, input_size), jnp.float32, -bound, bound)
    w_hh = jax.random.uniform(k2, (4 * hidden_size, hidden_size), jnp.float32, -bound, bound)
    b_ih = jax.random.uniform(k3, (4 * hidden_size,), jnp.float32, -bound, bound)
    b_hh = jax.random.uniform(k4, (4 * hidden_size,), jnp.float32, -bound, bound)
    packed_x = jax.random.normal(k5, (total, input_size), jnp.float32)

    # f32 weights -> tight tolerance (parity); bf16 (MXU fast path) -> loosened.
    for weight_dtype, tol in ((jnp.float32, 2e-3), (jnp.bfloat16, 2e-2)):
        for go_forward in (True, False):
            out, (hT, cT) = lstm_layer_forward(packed_x, batch_sizes,
                                               w_ih, w_hh, b_ih, b_hh,
                                               hidden_size, go_forward=go_forward,
                                               weight_dtype=weight_dtype)
            out = jax.block_until_ready(out)
            hT = jax.block_until_ready(hT)
            cT = jax.block_until_ready(cT)

            ref_out, ref_h, ref_c = ref_forward(np.asarray(packed_x), batch_sizes,
                                                np.asarray(w_ih), np.asarray(w_hh),
                                                np.asarray(b_ih), np.asarray(b_hh),
                                                hidden_size, go_forward)
            np.testing.assert_allclose(np.asarray(out), ref_out, rtol=tol, atol=tol)
            np.testing.assert_allclose(np.asarray(hT), ref_h, rtol=tol, atol=tol)
            np.testing.assert_allclose(np.asarray(cT), ref_c, rtol=tol, atol=tol)

    print("KERNEL_OK")
</pallas_src>

<mosaic_0001>
module attributes {stable_mosaic.version = 11 : i64} {
  func.func @_lstm_recurrent_kernel(%arg0: i32, %arg1: memref<8xi32, #tpu.memory_space<smem>>, %arg2: memref<64x32xf32, #tpu.memory_space<vmem>>, %arg3: memref<32x512xf32, #tpu.memory_space<vmem>>, %arg4: memref<128x512xf32, #tpu.memory_space<vmem>>, %arg5: memref<1x512xf32, #tpu.memory_space<vmem>>, %arg6: memref<8x8x128xf32, #tpu.memory_space<vmem>>, %arg7: memref<8x128xf32, #tpu.memory_space<vmem>>, %arg8: memref<8x128xf32, #tpu.memory_space<vmem>>, %arg9: memref<64x512xf32, #tpu.memory_space<vmem>>, %arg10: memref<8x128xf32, #tpu.memory_space<vmem>>, %arg11: memref<8x128xf32, #tpu.memory_space<vmem>>) attributes {dimension_semantics = [#tpu.dimension_semantics<arbitrary>], iteration_bounds = array<i64: 1>, scalar_prefetch = 1 : i64, scratch_operands = 3 : i64, tpu.core_type = #tpu.core_type<tc>, window_params = [{transform_indices = @transform_0, window_bounds = array<i64: 64, 32>}, {pipeline_mode = #tpu.pipeline_mode<synchronous>, transform_indices = @transform_1, window_bounds = array<i64: 32, 512>}, {pipeline_mode = #tpu.pipeline_mode<synchronous>, transform_indices = @transform_2, window_bounds = array<i64: 128, 512>}, {pipeline_mode = #tpu.pipeline_mode<synchronous>, transform_indices = @transform_3, window_bounds = array<i64: 1, 512>}, {transform_indices = @transform_4, window_bounds = array<i64: 8, 8, 128>}, {pipeline_mode = #tpu.pipeline_mode<synchronous>, transform_indices = @transform_5, window_bounds = array<i64: 8, 128>}, {pipeline_mode = #tpu.pipeline_mode<synchronous>, transform_indices = @transform_6, window_bounds = array<i64: 8, 128>}]} {
    %c0_i32 = arith.constant 0 : i32
    %0 = arith.cmpi eq, %arg0, %c0_i32 : i32
    %1 = arith.extui %0 : i1 to i32
    %c0_i32_0 = arith.constant 0 : i32
    %2 = arith.cmpi ne, %1, %c0_i32_0 : i32
    scf.if %2 {
      %cst_141 = arith.constant 0.000000e+00 : f32
      %411 = vector.broadcast %cst_141 : f32 to vector<8x128xf32>
      %c0_142 = arith.constant 0 : index
      %c0_143 = arith.constant 0 : index
      %412 = vector.load %arg10[%c0_142, %c0_143] : memref<8x128xf32, #tpu.memory_space<vmem>>, vector<8x128xf32>
      tpu.vector_store %arg10[%c0_142, %c0_143], %411 {strides = array<i32>} : memref<8x128xf32, #tpu.memory_space<vmem>>, vector<8x128xf32>,
      %cst_144 = arith.constant 0.000000e+00 : f32
      %413 = vector.broadcast %cst_144 : f32 to vector<8x128xf32>
      %c0_145 = arith.constant 0 : index
      %c0_146 = arith.constant 0 : index
      %414 = vector.load %arg11[%c0_145, %c0_146] : memref<8x128xf32, #tpu.memory_space<vmem>>, vector<8x128xf32>
      tpu.vector_store %arg11[%c0_145, %c0_146], %413 {strides = array<i32>} : memref<8x128xf32, #tpu.memory_space<vmem>>, vector<8x128xf32>,
    } else {
    }
    %c0 = arith.constant 0 : index
    %c0_1 = arith.constant 0 : index
    %3 = vector.load %arg3[%c0, %c0_1] : memref<32x512xf32, #tpu.memory_space<vmem>>, vector<32x512xf32>
    %c0_2 = arith.constant 0 : index
    %c0_3 = arith.constant 0 : index
    %4 = vector.load %arg2[%c0_2, %c0_3] : memref<64x32xf32, #tpu.memory_space<vmem>>, vector<64x32xf32>
    %cst = arith.constant dense<0.000000e+00> : vector<64x512xf32>
    %5 = tpu.matmul %4, %3, %cst {dimension_numbers = #tpu.dot_dimension_numbers<[1], [0], [0], [1], [0, 0, 1, 1], [], []>} : vector<64x32xf32>, vector<32x512xf32>, vector<64x512xf32> -> vector<64x512xf32>
    %c0_4 = arith.constant 0 : index
    %c0_5 = arith.constant 0 : index
    %6 = vector.load %arg5[%c0_4, %c0_5] : memref<1x512xf32, #tpu.memory_space<vmem>>, vector<1x512xf32>
    %7 = vector.broadcast %6 : vector<1x512xf32> to vector<64x512xf32>
    %8 = arith.addf %5, %7 : vector<64x512xf32>
    %c0_6 = arith.constant 0 : index
    %c0_7 = arith.constant 0 : index
    %9 = vector.load %arg9[%c0_6, %c0_7] : memref<64x512xf32, #tpu.memory_space<vmem>>, vector<64x512xf32>
    tpu.vector_store %arg9[%c0_6, %c0_7], %8 {strides = array<i32>} : memref<64x512xf32, #tpu.memory_space<vmem>>, vector<64x512xf32>,
    %c0_8 = arith.constant 0 : index
    %c0_9 = arith.constant 0 : index
    %10 = vector.load %arg4[%c0_8, %c0_9] : memref<128x512xf32, #tpu.memory_space<vmem>>, vector<128x512xf32>
    %11 = tpu.iota {dimensions = array<i32: 0>} : vector<8x128xi32>
    %c0_10 = arith.constant 0 : index
    %c0_11 = arith.constant 0 : index
    %12 = vector.load %arg10[%c0_10, %c0_11] : memref<8x128xf32, #tpu.memory_space<vmem>>, vector<8x128xf32>
    %c0_12 = arith.constant 0 : index
    %c0_13 = arith.constant 0 : index
    %13 = vector.load %arg11[%c0_12, %c0_13] : memref<8x128xf32, #tpu.memory_space<vmem>>, vector<8x128xf32>
    %c0_i32_14 = arith.constant 0 : i32
    %c8_i32 = arith.constant 8 : i32
    %14 = arith.muli %arg0, %c8_i32 : i32
    %15 = arith.addi %14, %c0_i32_14 : i32
    %16 = arith.index_cast %15 : i32 to index
    %17 = memref.load %arg1[%16] : memref<8xi32, #tpu.memory_space<smem>>
    %c8_i32_15 = arith.constant 8 : i32
    %18 = arith.muli %c0_i32_14, %c8_i32_15 : i32
    %19 = tpu.assume_multiple %18, 8 : i32
    %20 = arith.index_cast %19 : i32 to index
    %c0_16 = arith.constant 0 : index
    %21 = vector.load %arg9[%20, %c0_16] : memref<64x512xf32, #tpu.memory_space<vmem>>, vector<8x512xf32>
    %cst_17 = arith.constant dense<0.000000e+00> : vector<8x512xf32>
    %22 = tpu.matmul %12, %10, %cst_17 {dimension_numbers = #tpu.dot_dimension_numbers<[1], [0], [0], [1], [0, 0, 1, 1], [], []>} : vector<8x128xf32>, vector<128x512xf32>, vector<8x512xf32> -> vector<8x512xf32>
    %23 = arith.addf %21, %22 : vector<8x512xf32>
    %24 = vector.extract_strided_slice %23 {offsets = [0, 0], sizes = [8, 128], strides = [1, 1]} : vector<8x512xf32> to vector<8x128xf32>
    %cst_18 = arith.constant 5.000000e-01 : f32
    %25 = vector.broadcast %cst_18 : f32 to vector<8x128xf32>
    %26 = arith.mulf %25, %24 : vector<8x128xf32>
    %27 = math.tanh %26 : vector<8x128xf32>
    %cst_19 = arith.constant 5.000000e-01 : f32
    %28 = vector.broadcast %cst_19 : f32 to vector<8x128xf32>
    %29 = arith.mulf %28, %27 : vector<8x128xf32>
    %cst_20 = arith.constant 5.000000e-01 : f32
    %30 = vector.broadcast %cst_20 : f32 to vector<8x128xf32>
    %31 = arith.addf %29, %30 : vector<8x128xf32>
    %32 = vector.extract_strided_slice %23 {offsets = [0, 128], sizes = [8, 128], strides = [1, 1]} : vector<8x512xf32> to vector<8x128xf32>
    %cst_21 = arith.constant 5.000000e-01 : f32
    %33 = vector.broadcast %cst_21 : f32 to vector<8x128xf32>
    %34 = arith.mulf %33, %32 : vector<8x128xf32>
    %35 = math.tanh %34 : vector<8x128xf32>
    %cst_22 = arith.constant 5.000000e-01 : f32
    %36 = vector.broadcast %cst_22 : f32 to vector<8x128xf32>
    %37 = arith.mulf %36, %35 : vector<8x128xf32>
    %cst_23 = arith.constant 5.000000e-01 : f32
    %38 = vector.broadcast %cst_23 : f32 to vector<8x128xf32>
    %39 = arith.addf %37, %38 : vector<8x128xf32>
    %40 = vector.extract_strided_slice %23 {offsets = [0, 256], sizes = [8, 128], strides = [1, 1]} : vector<8x512xf32> to vector<8x128xf32>
    %41 = math.tanh %40 : vector<8x128xf32>
    %42 = vector.extract_strided_slice %23 {offsets = [0, 384], sizes = [8, 128], strides = [1, 1]} : vector<8x512xf32> to vector<8x128xf32>
    %cst_24 = arith.constant 5.000000e-01 : f32
    %43 = vector.broadcast %cst_24 : f32 to vector<8x128xf32>
    %44 = arith.mulf %43, %42 : vector<8x128xf32>
    %45 = math.tanh %44 : vector<8x128xf32>
    %cst_25 = arith.constant 5.000000e-01 : f32
    %46 = vector.broadcast %cst_25 : f32 to vector<8x128xf32>
    %47 = arith.mulf %46, %45 : vector<8x128xf32>
    %cst_26 = arith.constant 5.000000e-01 : f32
    %48 = vector.broadcast %cst_26 : f32 to vector<8x128xf32>
    %49 = arith.addf %47, %48 : vector<8x128xf32>
    %50 = arith.mulf %39, %13 : vector<8x128xf32>
    %51 = arith.mulf %31, %41 : vector<8x128xf32>
    %52 = arith.addf %50, %51 : vector<8x128xf32>
    %53 = math.tanh %52 : vector<8x128xf32>
    %54 = arith.mulf %49, %53 : vector<8x128xf32>
    %55 = arith.index_cast %c0_i32_14 : i32 to index
    %c0_27 = arith.constant 0 : index
    %c0_28 = arith.constant 0 : index
    %56 = vector.load %arg6[%55, %c0_27, %c0_28] : memref<8x8x128xf32, #tpu.memory_space<vmem>>, vector<1x8x128xf32>
    %57 = vector.shape_cast %56 : vector<1x8x128xf32> to vector<8x128xf32>
    %58 = vector.shape_cast %54 : vector<8x128xf32> to vector<1x8x128xf32>
    tpu.vector_store %arg6[%55, %c0_27, %c0_28], %58 {strides = array<i32>} : memref<8x8x128xf32, #tpu.memory_space<vmem>>, vector<1x8x128xf32>,
    %59 = vector.broadcast %17 : i32 to vector<8x128xi32>
    %60 = arith.cmpi slt, %11, %59 : vector<8x128xi32>
    %61 = arith.select %60, %54, %12 : vector<8x128xi1>, vector<8x128xf32>
    %62 = arith.select %60, %52, %13 : vector<8x128xi1>, vector<8x128xf32>
    %c1_i32 = arith.constant 1 : i32
    %c8_i32_29 = arith.constant 8 : i32
    %63 = arith.muli %arg0, %c8_i32_29 : i32
    %64 = arith.addi %63, %c1_i32 : i32
    %65 = arith.index_cast %64 : i32 to index
    %66 = memref.load %arg1[%65] : memref<8xi32, #tpu.memory_space<smem>>
    %c8_i32_30 = arith.constant 8 : i32
    %67 = arith.muli %c1_i32, %c8_i32_30 : i32
    %68 = tpu.assume_multiple %67, 8 : i32
    %69 = arith.index_cast %68 : i32 to index
    %c0_31 = arith.constant 0 : index
    %70 = vector.load %arg9[%69, %c0_31] : memref<64x512xf32, #tpu.memory_space<vmem>>, vector<8x512xf32>
    %cst_32 = arith.constant dense<0.000000e+00> : vector<8x512xf32>
    %71 = tpu.matmul %61, %10, %cst_32 {dimension_numbers = #tpu.dot_dimension_numbers<[1], [0], [0], [1], [0, 0, 1, 1], [], []>} : vector<8x128xf32>, vector<128x512xf32>, vector<8x512xf32> -> vector<8x512xf32>
    %72 = arith.addf %70, %71 : vector<8x512xf32>
    %73 = vector.extract_strided_slice %72 {offsets = [0, 0], sizes = [8, 128], strides = [1, 1]} : vector<8x512xf32> to vector<8x128xf32>
    %cst_33 = arith.constant 5.000000e-01 : f32
    %74 = vector.broadcast %cst_33 : f32 to vector<8x128xf32>
    %75 = arith.mulf %74, %73 : vector<8x128xf32>
    %76 = math.tanh %75 : vector<8x128xf32>
    %cst_34 = arith.constant 5.000000e-01 : f32
    %77 = vector.broadcast %cst_34 : f32 to vector<8x128xf32>
    %78 = arith.mulf %77, %76 : vector<8x128xf32>
    %cst_35 = arith.constant 5.000000e-01 : f32
    %79 = vector.broadcast %cst_35 : f32 to vector<8x128xf32>
    %80 = arith.addf %78, %79 : vector<8x128xf32>
    %81 = vector.extract_strided_slice %72 {offsets = [0, 128], sizes = [8, 128], strides = [1, 1]} : vector<8x512xf32> to vector<8x128xf32>
    %cst_36 = arith.constant 5.000000e-01 : f32
    %82 = vector.broadcast %cst_36 : f32 to vector<8x128xf32>
    %83 = arith.mulf %82, %81 : vector<8x128xf32>
    %84 = math.tanh %83 : vector<8x128xf32>
    %cst_37 = arith.constant 5.000000e-01 : f32
    %85 = vector.broadcast %cst_37 : f32 to vector<8x128xf32>
    %86 = arith.mulf %85, %84 : vector<8x128xf32>
    %cst_38 = arith.constant 5.000000e-01 : f32
    %87 = vector.broadcast %cst_38 : f32 to vector<8x128xf32>
    %88 = arith.addf %86, %87 : vector<8x128xf32>
    %89 = vector.extract_strided_slice %72 {offsets = [0, 256], sizes = [8, 128], strides = [1, 1]} : vector<8x512xf32> to vector<8x128xf32>
    %90 = math.tanh %89 : vector<8x128xf32>
    %91 = vector.extract_strided_slice %72 {offsets = [0, 384], sizes = [8, 128], strides = [1, 1]} : vector<8x512xf32> to vector<8x128xf32>
    %cst_39 = arith.constant 5.000000e-01 : f32
    %92 = vector.broadcast %cst_39 : f32 to vector<8x128xf32>
    %93 = arith.mulf %92, %91 : vector<8x128xf32>
    %94 = math.tanh %93 : vector<8x128xf32>
    %cst_40 = arith.constant 5.000000e-01 : f32
    %95 = vector.broadcast %cst_40 : f32 to vector<8x128xf32>
    %96 = arith.mulf %95, %94 : vector<8x128xf32>
    %cst_41 = arith.constant 5.000000e-01 : f32
    %97 = vector.broadcast %cst_41 : f32 to vector<8x128xf32>
    %98 = arith.addf %96, %97 : vector<8x128xf32>
    %99 = arith.mulf %88, %62 : vector<8x128xf32>
    %100 = arith.mulf %80, %90 : vector<8x128xf32>
    %101 = arith.addf %99, %100 : vector<8x128xf32>
    %102 = math.tanh %101 : vector<8x128xf32>
    %103 = arith.mulf %98, %102 : vector<8x128xf32>
    %104 = arith.index_cast %c1_i32 : i32 to index
    %c0_42 = arith.constant 0 : index
    %c0_43 = arith.constant 0 : index
    %105 = vector.load %arg6[%104, %c0_42, %c0_43] : memref<8x8x128xf32, #tpu.memory_space<vmem>>, vector<1x8x128xf32>
    %106 = vector.shape_cast %105 : vector<1x8x128xf32> to vector<8x128xf32>
    %107 = vector.shape_cast %103 : vector<8x128xf32> to vector<1x8x128xf32>
    tpu.vector_store %arg6[%104, %c0_42, %c0_43], %107 {strides = array<i32>} : memref<8x8x128xf32, #tpu.memory_space<vmem>>, vector<1x8x128xf32>,
    %108 = vector.broadcast %66 : i32 to vector<8x128xi32>
    %109 = arith.cmpi slt, %11, %108 : vector<8x128xi32>
    %110 = arith.select %109, %103, %61 : vector<8x128xi1>, vector<8x128xf32>
    %111 = arith.select %109, %101, %62 : vector<8x128xi1>, vector<8x128xf32>
    %c2_i32 = arith.constant 2 : i32
    %c8_i32_44 = arith.constant 8 : i32
    %112 = arith.muli %arg0, %c8_i32_44 : i32
    %113 = arith.addi %112, %c2_i32 : i32
    %114 = arith.index_cast %113 : i32 to index
    %115 = memref.load %arg1[%114] : memref<8xi32, #tpu.memory_space<smem>>
    %c8_i32_45 = arith.constant 8 : i32
    %116 = arith.muli %c2_i32, %c8_i32_45 : i32
    %117 = tpu.assume_multiple %116, 8 : i32
    %118 = arith.index_cast %117 : i32 to index
    %c0_46 = arith.constant 0 : index
    %119 = vector.load %arg9[%118, %c0_46] : memref<64x512xf32, #tpu.memory_space<vmem>>, vector<8x512xf32>
    %cst_47 = arith.constant dense<0.000000e+00> : vector<8x512xf32>
    %120 = tpu.matmul %110, %10, %cst_47 {dimension_numbers = #tpu.dot_dimension_numbers<[1], [0], [0], [1], [0, 0, 1, 1], [], []>} : vector<8x128xf32>, vector<128x512xf32>, vector<8x512xf32> -> vector<8x512xf32>
    %121 = arith.addf %119, %120 : vector<8x512xf32>
    %122 = vector.extract_strided_slice %121 {offsets = [0, 0], sizes = [8, 128], strides = [1, 1]} : vector<8x512xf32> to vector<8x128xf32>
    %cst_48 = arith.constant 5.000000e-01 : f32
    %123 = vector.broadcast %cst_48 : f32 to vector<8x128xf32>
    %124 = arith.mulf %123, %122 : vector<8x128xf32>
    %125 = math.tanh %124 : vector<8x128xf32>
    %cst_49 = arith.constant 5.000000e-01 : f32
    %126 = vector.broadcast %cst_49 : f32 to vector<8x128xf32>
    %127 = arith.mulf %126, %125 : vector<8x128xf32>
    %cst_50 = arith.constant 5.000000e-01 : f32
    %128 = vector.broadcast %cst_50 : f32 to vector<8x128xf32>
    %129 = arith.addf %127, %128 : vector<8x128xf32>
    %130 = vector.extract_strided_slice %121 {offsets = [0, 128], sizes = [8, 128], strides = [1, 1]} : vector<8x512xf32> to vector<8x128xf32>
    %cst_51 = arith.constant 5.000000e-01 : f32
    %131 = vector.broadcast %cst_51 : f32 to vector<8x128xf32>
    %132 = arith.mulf %131, %130 : vector<8x128xf32>
    %133 = math.tanh %132 : vector<8x128xf32>
    %cst_52 = arith.constant 5.000000e-01 : f32
    %134 = vector.broadcast %cst_52 : f32 to vector<8x128xf32>
    %135 = arith.mulf %134, %133 : vector<8x128xf32>
    %cst_53 = arith.constant 5.000000e-01 : f32
    %136 = vector.broadcast %cst_53 : f32 to vector<8x128xf32>
    %137 = arith.addf %135, %136 : vector<8x128xf32>
    %138 = vector.extract_strided_slice %121 {offsets = [0, 256], sizes = [8, 128], strides = [1, 1]} : vector<8x512xf32> to vector<8x128xf32>
    %139 = math.tanh %138 : vector<8x128xf32>
    %140 = vector.extract_strided_slice %121 {offsets = [0, 384], sizes = [8, 128], strides = [1, 1]} : vector<8x512xf32> to vector<8x128xf32>
    %cst_54 = arith.constant 5.000000e-01 : f32
    %141 = vector.broadcast %cst_54 : f32 to vector<8x128xf32>
    %142 = arith.mulf %141, %140 : vector<8x128xf32>
    %143 = math.tanh %142 : vector<8x128xf32>
    %cst_55 = arith.constant 5.000000e-01 : f32
    %144 = vector.broadcast %cst_55 : f32 to vector<8x128xf32>
    %145 = arith.mulf %144, %143 : vector<8x128xf32>
    %cst_56 = arith.constant 5.000000e-01 : f32
    %146 = vector.broadcast %cst_56 : f32 to vector<8x128xf32>
    %147 = arith.addf %145, %146 : vector<8x128xf32>
    %148 = arith.mulf %137, %111 : vector<8x128xf32>
    %149 = arith.mulf %129, %139 : vector<8x128xf32>
    %150 = arith.addf %148, %149 : vector<8x128xf32>
    %151 = math.tanh %150 : vector<8x128xf32>
    %152 = arith.mulf %147, %151 : vector<8x128xf32>
    %153 = arith.index_cast %c2_i32 : i32 to index
    %c0_57 = arith.constant 0 : index
    %c0_58 = arith.constant 0 : index
    %154 = vector.load %arg6[%153, %c0_57, %c0_58] : memref<8x8x128xf32, #tpu.memory_space<vmem>>, vector<1x8x128xf32>
    %155 = vector.shape_cast %154 : vector<1x8x128xf32> to vector<8x128xf32>
    %156 = vector.shape_cast %152 : vector<8x128xf32> to vector<1x8x128xf32>
    tpu.vector_store %arg6[%153, %c0_57, %c0_58], %156 {strides = array<i32>} : memref<8x8x128xf32, #tpu.memory_space<vmem>>, vector<1x8x128xf32>,
    %157 = vector.broadcast %115 : i32 to vector<8x128xi32>
    %158 = arith.cmpi slt, %11, %157 : vector<8x128xi32>
    %159 = arith.select %158, %152, %110 : vector<8x128xi1>, vector<8x128xf32>
    %160 = arith.select %158, %150, %111 : vector<8x128xi1>, vector<8x128xf32>
    %c3_i32 = arith.constant 3 : i32
    %c8_i32_59 = arith.constant 8 : i32
    %161 = arith.muli %arg0, %c8_i32_59 : i32
    %162 = arith.addi %161, %c3_i32 : i32
    %163 = arith.index_cast %162 : i32 to index
    %164 = memref.load %arg1[%163] : memref<8xi32, #tpu.memory_space<smem>>
    %c8_i32_60 = arith.constant 8 : i32
    %165 = arith.muli %c3_i32, %c8_i32_60 : i32
    %166 = tpu.assume_multiple %165, 8 : i32
    %167 = arith.index_cast %166 : i32 to index
    %c0_61 = arith.constant 0 : index
    %168 = vector.load %arg9[%167, %c0_61] : memref<64x512xf32, #tpu.memory_space<vmem>>, vector<8x512xf32>
    %cst_62 = arith.constant dense<0.000000e+00> : vector<8x512xf32>
    %169 = tpu.matmul %159, %10, %cst_62 {dimension_numbers = #tpu.dot_dimension_numbers<[1], [0], [0], [1], [0, 0, 1, 1], [], []>} : vector<8x128xf32>, vector<128x512xf32>, vector<8x512xf32> -> vector<8x512xf32>
    %170 = arith.addf %168, %169 : vector<8x512xf32>
    %171 = vector.extract_strided_slice %170 {offsets = [0, 0], sizes = [8, 128], strides = [1, 1]} : vector<8x512xf32> to vector<8x128xf32>
    %cst_63 = arith.constant 5.000000e-01 : f32
    %172 = vector.broadcast %cst_63 : f32 to vector<8x128xf32>
    %173 = arith.mulf %172, %171 : vector<8x128xf32>
    %174 = math.tanh %173 : vector<8x128xf32>
    %cst_64 = arith.constant 5.000000e-01 : f32
    %175 = vector.broadcast %cst_64 : f32 to vector<8x128xf32>
    %176 = arith.mulf %175, %174 : vector<8x128xf32>
    %cst_65 = arith.constant 5.000000e-01 : f32
    %177 = vector.broadcast %cst_65 : f32 to vector<8x128xf32>
    %178 = arith.addf %176, %177 : vector<8x128xf32>
    %179 = vector.extract_strided_slice %170 {offsets = [0, 128], sizes = [8, 128], strides = [1, 1]} : vector<8x512xf32> to vector<8x128xf32>
    %cst_66 = arith.constant 5.000000e-01 : f32
    %180 = vector.broadcast %cst_66 : f32 to vector<8x128xf32>
    %181 = arith.mulf %180, %179 : vector<8x128xf32>
    %182 = math.tanh %181 : vector<8x128xf32>
    %cst_67 = arith.constant 5.000000e-01 : f32
    %183 = vector.broadcast %cst_67 : f32 to vector<8x128xf32>
    %184 = arith.mulf %183, %182 : vector<8x128xf32>
    %cst_68 = arith.constant 5.000000e-01 : f32
    %185 = vector.broadcast %cst_68 : f32 to vector<8x128xf32>
    %186 = arith.addf %184, %185 : vector<8x128xf32>
    %187 = vector.extract_strided_slice %170 {offsets = [0, 256], sizes = [8, 128], strides = [1, 1]} : vector<8x512xf32> to vector<8x128xf32>
    %188 = math.tanh %187 : vector<8x128xf32>
    %189 = vector.extract_strided_slice %170 {offsets = [0, 384], sizes = [8, 128], strides = [1, 1]} : vector<8x512xf32> to vector<8x128xf32>
    %cst_69 = arith.constant 5.000000e-01 : f32
    %190 = vector.broadcast %cst_69 : f32 to vector<8x128xf32>
    %191 = arith.mulf %190, %189 : vector<8x128xf32>
    %192 = math.tanh %191 : vector<8x128xf32>
    %cst_70 = arith.constant 5.000000e-01 : f32
    %193 = vector.broadcast %cst_70 : f32 to vector<8x128xf32>
    %194 = arith.mulf %193, %192 : vector<8x128xf32>
    %cst_71 = arith.constant 5.000000e-01 : f32
    %195 = vector.broadcast %cst_71 : f32 to vector<8x128xf32>
    %196 = arith.addf %194, %195 : vector<8x128xf32>
    %197 = arith.mulf %186, %160 : vector<8x128xf32>
    %198 = arith.mulf %178, %188 : vector<8x128xf32>
    %199 = arith.addf %197, %198 : vector<8x128xf32>
    %200 = math.tanh %199 : vector<8x128xf32>
    %201 = arith.mulf %196, %200 : vector<8x128xf32>
    %202 = arith.index_cast %c3_i32 : i32 to index
    %c0_72 = arith.constant 0 : index
    %c0_73 = arith.constant 0 : index
    %203 = vector.load %arg6[%202, %c0_72, %c0_73] : memref<8x8x128xf32, #tpu.memory_space<vmem>>, vector<1x8x128xf32>
    %204 = vector.shape_cast %203 : vector<1x8x128xf32> to vector<8x128xf32>
    %205 = vector.shape_cast %201 : vector<8x128xf32> to vector<1x8x128xf32>
    tpu.vector_store %arg6[%202, %c0_72, %c0_73], %205 {strides = array<i32>} : memref<8x8x128xf32, #tpu.memory_space<vmem>>, vector<1x8x128xf32>,
    %206 = vector.broadcast %164 : i32 to vector<8x128xi32>
    %207 = arith.cmpi slt, %11, %206 : vector<8x128xi32>
    %208 = arith.select %207, %201, %159 : vector<8x128xi1>, vector<8x128xf32>
    %209 = arith.select %207, %199, %160 : vector<8x128xi1>, vector<8x128xf32>
    %c4_i32 = arith.constant 4 : i32
    %c8_i32_74 = arith.constant 8 : i32
    %210 = arith.muli %arg0, %c8_i32_74 : i32
    %211 = arith.addi %210, %c4_i32 : i32
    %212 = arith.index_cast %211 : i32 to index
    %213 = memref.load %arg1[%212] : memref<8xi32, #tpu.memory_space<smem>>
    %c8_i32_75 = arith.constant 8 : i32
    %214 = arith.muli %c4_i32, %c8_i32_75 : i32
    %215 = tpu.assume_multiple %214, 8 : i32
    %216 = arith.index_cast %215 : i32 to index
    %c0_76 = arith.constant 0 : index
    %217 = vector.load %arg9[%216, %c0_76] : memref<64x512xf32, #tpu.memory_space<vmem>>, vector<8x512xf32>
    %cst_77 = arith.constant dense<0.000000e+00> : vector<8x512xf32>
    %218 = tpu.matmul %208, %10, %cst_77 {dimension_numbers = #tpu.dot_dimension_numbers<[1], [0], [0], [1], [0, 0, 1, 1], [], []>} : vector<8x128xf32>, vector<128x512xf32>, vector<8x512xf32> -> vector<8x512xf32>
    %219 = arith.addf %217, %218 : vector<8x512xf32>
    %220 = vector.extract_strided_slice %219 {offsets = [0, 0], sizes = [8, 128], strides = [1, 1]} : vector<8x512xf32> to vector<8x128xf32>
    %cst_78 = arith.constant 5.000000e-01 : f32
    %221 = vector.broadcast %cst_78 : f32 to vector<8x128xf32>
    %222 = arith.mulf %221, %220 : vector<8x128xf32>
    %223 = math.tanh %222 : vector<8x128xf32>
    %cst_79 = arith.constant 5.000000e-01 : f32
    %224 = vector.broadcast %cst_79 : f32 to vector<8x128xf32>
    %225 = arith.mulf %224, %223 : vector<8x128xf32>
    %cst_80 = arith.constant 5.000000e-01 : f32
    %226 = vector.broadcast %cst_80 : f32 to vector<8x128xf32>
    %227 = arith.addf %225, %226 : vector<8x128xf32>
    %228 = vector.extract_strided_slice %219 {offsets = [0, 128], sizes = [8, 128], strides = [1, 1]} : vector<8x512xf32> to vector<8x128xf32>
    %cst_81 = arith.constant 5.000000e-01 : f32
    %229 = vector.broadcast %cst_81 : f32 to vector<8x128xf32>
    %230 = arith.mulf %229, %228 : vector<8x128xf32>
    %231 = math.tanh %230 : vector<8x128xf32>
    %cst_82 = arith.constant 5.000000e-01 : f32
    %232 = vector.broadcast %cst_82 : f32 to vector<8x128xf32>
    %233 = arith.mulf %232, %231 : vector<8x128xf32>
    %cst_83 = arith.constant 5.000000e-01 : f32
    %234 = vector.broadcast %cst_83 : f32 to vector<8x128xf32>
    %235 = arith.addf %233, %234 : vector<8x128xf32>
    %236 = vector.extract_strided_slice %219 {offsets = [0, 256], sizes = [8, 128], strides = [1, 1]} : vector<8x512xf32> to vector<8x128xf32>
    %237 = math.tanh %236 : vector<8x128xf32>
    %238 = vector.extract_strided_slice %219 {offsets = [0, 384], sizes = [8, 128], strides = [1, 1]} : vector<8x512xf32> to vector<8x128xf32>
    %cst_84 = arith.constant 5.000000e-01 : f32
    %239 = vector.broadcast %cst_84 : f32 to vector<8x128xf32>
    %240 = arith.mulf %239, %238 : vector<8x128xf32>
    %241 = math.tanh %240 : vector<8x128xf32>
    %cst_85 = arith.constant 5.000000e-01 : f32
    %242 = vector.broadcast %cst_85 : f32 to vector<8x128xf32>
    %243 = arith.mulf %242, %241 : vector<8x128xf32>
    %cst_86 = arith.constant 5.000000e-01 : f32
    %244 = vector.broadcast %cst_86 : f32 to vector<8x128xf32>
    %245 = arith.addf %243, %244 : vector<8x128xf32>
    %246 = arith.mulf %235, %209 : vector<8x128xf32>
    %247 = arith.mulf %227, %237 : vector<8x128xf32>
    %248 = arith.addf %246, %247 : vector<8x128xf32>
    %249 = math.tanh %248 : vector<8x128xf32>
    %250 = arith.mulf %245, %249 : vector<8x128xf32>
    %251 = arith.index_cast %c4_i32 : i32 to index
    %c0_87 = arith.constant 0 : index
    %c0_88 = arith.constant 0 : index
    %252 = vector.load %arg6[%251, %c0_87, %c0_88] : memref<8x8x128xf32, #tpu.memory_space<vmem>>, vector<1x8x128xf32>
    %253 = vector.shape_cast %252 : vector<1x8x128xf32> to vector<8x128xf32>
    %254 = vector.shape_cast %250 : vector<8x128xf32> to vector<1x8x128xf32>
    tpu.vector_store %arg6[%251, %c0_87, %c0_88], %254 {strides = array<i32>} : memref<8x8x128xf32, #tpu.memory_space<vmem>>, vector<1x8x128xf32>,
    %255 = vector.broadcast %213 : i32 to vector<8x128xi32>
    %256 = arith.cmpi slt, %11, %255 : vector<8x128xi32>
    %257 = arith.select %256, %250, %208 : vector<8x128xi1>, vector<8x128xf32>
    %258 = arith.select %256, %248, %209 : vector<8x128xi1>, vector<8x128xf32>
    %c5_i32 = arith.constant 5 : i32
    %c8_i32_89 = arith.constant 8 : i32
    %259 = arith.muli %arg0, %c8_i32_89 : i32
    %260 = arith.addi %259, %c5_i32 : i32
    %261 = arith.index_cast %260 : i32 to index
    %262 = memref.load %arg1[%261] : memref<8xi32, #tpu.memory_space<smem>>
    %c8_i32_90 = arith.constant 8 : i32
    %263 = arith.muli %c5_i32, %c8_i32_90 : i32
    %264 = tpu.assume_multiple %263, 8 : i32
    %265 = arith.index_cast %264 : i32 to index
    %c0_91 = arith.constant 0 : index
    %266 = vector.load %arg9[%265, %c0_91] : memref<64x512xf32, #tpu.memory_space<vmem>>, vector<8x512xf32>
    %cst_92 = arith.constant dense<0.000000e+00> : vector<8x512xf32>
    %267 = tpu.matmul %257, %10, %cst_92 {dimension_numbers = #tpu.dot_dimension_numbers<[1], [0], [0], [1], [0, 0, 1, 1], [], []>} : vector<8x128xf32>, vector<128x512xf32>, vector<8x512xf32> -> vector<8x512xf32>
    %268 = arith.addf %266, %267 : vector<8x512xf32>
    %269 = vector.extract_strided_slice %268 {offsets = [0, 0], sizes = [8, 128], strides = [1, 1]} : vector<8x512xf32> to vector<8x128xf32>
    %cst_93 = arith.constant 5.000000e-01 : f32
    %270 = vector.broadcast %cst_93 : f32 to vector<8x128xf32>
    %271 = arith.mulf %270, %269 : vector<8x128xf32>
    %272 = math.tanh %271 : vector<8x128xf32>
    %cst_94 = arith.constant 5.000000e-01 : f32
    %273 = vector.broadcast %cst_94 : f32 to vector<8x128xf32>
    %274 = arith.mulf %273, %272 : vector<8x128xf32>
    %cst_95 = arith.constant 5.000000e-01 : f32
    %275 = vector.broadcast %cst_95 : f32 to vector<8x128xf32>
    %276 = arith.addf %274, %275 : vector<8x128xf32>
    %277 = vector.extract_strided_slice %268 {offsets = [0, 128], sizes = [8, 128], strides = [1, 1]} : vector<8x512xf32> to vector<8x128xf32>
    %cst_96 = arith.constant 5.000000e-01 : f32
    %278 = vector.broadcast %cst_96 : f32 to vector<8x128xf32>
    %279 = arith.mulf %278, %277 : vector<8x128xf32>
    %280 = math.tanh %279 : vector<8x128xf32>
    %cst_97 = arith.constant 5.000000e-01 : f32
    %281 = vector.broadcast %cst_97 : f32 to vector<8x128xf32>
    %282 = arith.mulf %281, %280 : vector<8x128xf32>
    %cst_98 = arith.constant 5.000000e-01 : f32
    %283 = vector.broadcast %cst_98 : f32 to vector<8x128xf32>
    %284 = arith.addf %282, %283 : vector<8x128xf32>
    %285 = vector.extract_strided_slice %268 {offsets = [0, 256], sizes = [8, 128], strides = [1, 1]} : vector<8x512xf32> to vector<8x128xf32>
    %286 = math.tanh %285 : vector<8x128xf32>
    %287 = vector.extract_strided_slice %268 {offsets = [0, 384], sizes = [8, 128], strides = [1, 1]} : vector<8x512xf32> to vector<8x128xf32>
    %cst_99 = arith.constant 5.000000e-01 : f32
    %288 = vector.broadcast %cst_99 : f32 to vector<8x128xf32>
    %289 = arith.mulf %288, %287 : vector<8x128xf32>
    %290 = math.tanh %289 : vector<8x128xf32>
    %cst_100 = arith.constant 5.000000e-01 : f32
    %291 = vector.broadcast %cst_100 : f32 to vector<8x128xf32>
    %292 = arith.mulf %291, %290 : vector<8x128xf32>
    %cst_101 = arith.constant 5.000000e-01 : f32
    %293 = vector.broadcast %cst_101 : f32 to vector<8x128xf32>
    %294 = arith.addf %292, %293 : vector<8x128xf32>
    %295 = arith.mulf %284, %258 : vector<8x128xf32>
    %296 = arith.mulf %276, %286 : vector<8x128xf32>
    %297 = arith.addf %295, %296 : vector<8x128xf32>
    %298 = math.tanh %297 : vector<8x128xf32>
    %299 = arith.mulf %294, %298 : vector<8x128xf32>
    %300 = arith.index_cast %c5_i32 : i32 to index
    %c0_102 = arith.constant 0 : index
    %c0_103 = arith.constant 0 : index
    %301 = vector.load %arg6[%300, %c0_102, %c0_103] : memref<8x8x128xf32, #tpu.memory_space<vmem>>, vector<1x8x128xf32>
    %302 = vector.shape_cast %301 : vector<1x8x128xf32> to vector<8x128xf32>
    %303 = vector.shape_cast %299 : vector<8x128xf32> to vector<1x8x128xf32>
    tpu.vector_store %arg6[%300, %c0_102, %c0_103], %303 {strides = array<i32>} : memref<8x8x128xf32, #tpu.memory_space<vmem>>, vector<1x8x128xf32>,
    %304 = vector.broadcast %262 : i32 to vector<8x128xi32>
    %305 = arith.cmpi slt, %11, %304 : vector<8x128xi32>
    %306 = arith.select %305, %299, %257 : vector<8x128xi1>, vector<8x128xf32>
    %307 = arith.select %305, %297, %258 : vector<8x128xi1>, vector<8x128xf32>
    %c6_i32 = arith.constant 6 : i32
    %c8_i32_104 = arith.constant 8 : i32
    %308 = arith.muli %arg0, %c8_i32_104 : i32
    %309 = arith.addi %308, %c6_i32 : i32
    %310 = arith.index_cast %309 : i32 to index
    %311 = memref.load %arg1[%310] : memref<8xi32, #tpu.memory_space<smem>>
    %c8_i32_105 = arith.constant 8 : i32
    %312 = arith.muli %c6_i32, %c8_i32_105 : i32
    %313 = tpu.assume_multiple %312, 8 : i32
    %314 = arith.index_cast %313 : i32 to index
    %c0_106 = arith.constant 0 : index
    %315 = vector.load %arg9[%314, %c0_106] : memref<64x512xf32, #tpu.memory_space<vmem>>, vector<8x512xf32>
    %cst_107 = arith.constant dense<0.000000e+00> : vector<8x512xf32>
    %316 = tpu.matmul %306, %10, %cst_107 {dimension_numbers = #tpu.dot_dimension_numbers<[1], [0], [0], [1], [0, 0, 1, 1], [], []>} : vector<8x128xf32>, vector<128x512xf32>, vector<8x512xf32> -> vector<8x512xf32>
    %317 = arith.addf %315, %316 : vector<8x512xf32>
    %318 = vector.extract_strided_slice %317 {offsets = [0, 0], sizes = [8, 128], strides = [1, 1]} : vector<8x512xf32> to vector<8x128xf32>
    %cst_108 = arith.constant 5.000000e-01 : f32
    %319 = vector.broadcast %cst_108 : f32 to vector<8x128xf32>
    %320 = arith.mulf %319, %318 : vector<8x128xf32>
    %321 = math.tanh %320 : vector<8x128xf32>
    %cst_109 = arith.constant 5.000000e-01 : f32
    %322 = vector.broadcast %cst_109 : f32 to vector<8x128xf32>
    %323 = arith.mulf %322, %321 : vector<8x128xf32>
    %cst_110 = arith.constant 5.000000e-01 : f32
    %324 = vector.broadcast %cst_110 : f32 to vector<8x128xf32>
    %325 = arith.addf %323, %324 : vector<8x128xf32>
    %326 = vector.extract_strided_slice %317 {offsets = [0, 128], sizes = [8, 128], strides = [1, 1]} : vector<8x512xf32> to vector<8x128xf32>
    %cst_111 = arith.constant 5.000000e-01 : f32
    %327 = vector.broadcast %cst_111 : f32 to vector<8x128xf32>
    %328 = arith.mulf %327, %326 : vector<8x128xf32>
    %329 = math.tanh %328 : vector<8x128xf32>
    %cst_112 = arith.constant 5.000000e-01 : f32
    %330 = vector.broadcast %cst_112 : f32 to vector<8x128xf32>
    %331 = arith.mulf %330, %329 : vector<8x128xf32>
    %cst_113 = arith.constant 5.000000e-01 : f32
    %332 = vector.broadcast %cst_113 : f32 to vector<8x128xf32>
    %333 = arith.addf %331, %332 : vector<8x128xf32>
    %334 = vector.extract_strided_slice %317 {offsets = [0, 256], sizes = [8, 128], strides = [1, 1]} : vector<8x512xf32> to vector<8x128xf32>
    %335 = math.tanh %334 : vector<8x128xf32>
    %336 = vector.extract_strided_slice %317 {offsets = [0, 384], sizes = [8, 128], strides = [1, 1]} : vector<8x512xf32> to vector<8x128xf32>
    %cst_114 = arith.constant 5.000000e-01 : f32
    %337 = vector.broadcast %cst_114 : f32 to vector<8x128xf32>
    %338 = arith.mulf %337, %336 : vector<8x128xf32>
    %339 = math.tanh %338 : vector<8x128xf32>
    %cst_115 = arith.constant 5.000000e-01 : f32
    %340 = vector.broadcast %cst_115 : f32 to vector<8x128xf32>
    %341 = arith.mulf %340, %339 : vector<8x128xf32>
    %cst_116 = arith.constant 5.000000e-01 : f32
    %342 = vector.broadcast %cst_116 : f32 to vector<8x128xf32>
    %343 = arith.addf %341, %342 : vector<8x128xf32>
    %344 = arith.mulf %333, %307 : vector<8x128xf32>
    %345 = arith.mulf %325, %335 : vector<8x128xf32>
    %346 = arith.addf %344, %345 : vector<8x128xf32>
    %347 = math.tanh %346 : vector<8x128xf32>
    %348 = arith.mulf %343, %347 : vector<8x128xf32>
    %349 = arith.index_cast %c6_i32 : i32 to index
    %c0_117 = arith.constant 0 : index
    %c0_118 = arith.constant 0 : index
    %350 = vector.load %arg6[%349, %c0_117, %c0_118] : memref<8x8x128xf32, #tpu.memory_space<vmem>>, vector<1x8x128xf32>
    %351 = vector.shape_cast %350 : vector<1x8x128xf32> to vector<8x128xf32>
    %352 = vector.shape_cast %348 : vector<8x128xf32> to vector<1x8x128xf32>
    tpu.vector_store %arg6[%349, %c0_117, %c0_118], %352 {strides = array<i32>} : memref<8x8x128xf32, #tpu.memory_space<vmem>>, vector<1x8x128xf32>,
    %353 = vector.broadcast %311 : i32 to vector<8x128xi32>
    %354 = arith.cmpi slt, %11, %353 : vector<8x128xi32>
    %355 = arith.select %354, %348, %306 : vector<8x128xi1>, vector<8x128xf32>
    %356 = arith.select %354, %346, %307 : vector<8x128xi1>, vector<8x128xf32>
    %c7_i32 = arith.constant 7 : i32
    %c8_i32_119 = arith.constant 8 : i32
    %357 = arith.muli %arg0, %c8_i32_119 : i32
    %358 = arith.addi %357, %c7_i32 : i32
    %359 = arith.index_cast %358 : i32 to index
    %360 = memref.load %arg1[%359] : memref<8xi32, #tpu.memory_space<smem>>
    %c8_i32_120 = arith.constant 8 : i32
    %361 = arith.muli %c7_i32, %c8_i32_120 : i32
    %362 = tpu.assume_multiple %361, 8 : i32
    %363 = arith.index_cast %362 : i32 to index
    %c0_121 = arith.constant 0 : index
    %364 = vector.load %arg9[%363, %c0_121] : memref<64x512xf32, #tpu.memory_space<vmem>>, vector<8x512xf32>
    %cst_122 = arith.constant dense<0.000000e+00> : vector<8x512xf32>
    %365 = tpu.matmul %355, %10, %cst_122 {dimension_numbers = #tpu.dot_dimension_numbers<[1], [0], [0], [1], [0, 0, 1, 1], [], []>} : vector<8x128xf32>, vector<128x512xf32>, vector<8x512xf32> -> vector<8x512xf32>
    %366 = arith.addf %364, %365 : vector<8x512xf32>
    %367 = vector.extract_strided_slice %366 {offsets = [0, 0], sizes = [8, 128], strides = [1, 1]} : vector<8x512xf32> to vector<8x128xf32>
    %cst_123 = arith.constant 5.000000e-01 : f32
    %368 = vector.broadcast %cst_123 : f32 to vector<8x128xf32>
    %369 = arith.mulf %368, %367 : vector<8x128xf32>
    %370 = math.tanh %369 : vector<8x128xf32>
    %cst_124 = arith.constant 5.000000e-01 : f32
    %371 = vector.broadcast %cst_124 : f32 to vector<8x128xf32>
    %372 = arith.mulf %371, %370 : vector<8x128xf32>
    %cst_125 = arith.constant 5.000000e-01 : f32
    %373 = vector.broadcast %cst_125 : f32 to vector<8x128xf32>
    %374 = arith.addf %372, %373 : vector<8x128xf32>
    %375 = vector.extract_strided_slice %366 {offsets = [0, 128], sizes = [8, 128], strides = [1, 1]} : vector<8x512xf32> to vector<8x128xf32>
    %cst_126 = arith.constant 5.000000e-01 : f32
    %376 = vector.broadcast %cst_126 : f32 to vector<8x128xf32>
    %377 = arith.mulf %376, %375 : vector<8x128xf32>
    %378 = math.tanh %377 : vector<8x128xf32>
    %cst_127 = arith.constant 5.000000e-01 : f32
    %379 = vector.broadcast %cst_127 : f32 to vector<8x128xf32>
    %380 = arith.mulf %379, %378 : vector<8x128xf32>
    %cst_128 = arith.constant 5.000000e-01 : f32
    %381 = vector.broadcast %cst_128 : f32 to vector<8x128xf32>
    %382 = arith.addf %380, %381 : vector<8x128xf32>
    %383 = vector.extract_strided_slice %366 {offsets = [0, 256], sizes = [8, 128], strides = [1, 1]} : vector<8x512xf32> to vector<8x128xf32>
    %384 = math.tanh %383 : vector<8x128xf32>
    %385 = vector.extract_strided_slice %366 {offsets = [0, 384], sizes = [8, 128], strides = [1, 1]} : vector<8x512xf32> to vector<8x128xf32>
    %cst_129 = arith.constant 5.000000e-01 : f32
    %386 = vector.broadcast %cst_129 : f32 to vector<8x128xf32>
    %387 = arith.mulf %386, %385 : vector<8x128xf32>
    %388 = math.tanh %387 : vector<8x128xf32>
    %cst_130 = arith.constant 5.000000e-01 : f32
    %389 = vector.broadcast %cst_130 : f32 to vector<8x128xf32>
    %390 = arith.mulf %389, %388 : vector<8x128xf32>
    %cst_131 = arith.constant 5.000000e-01 : f32
    %391 = vector.broadcast %cst_131 : f32 to vector<8x128xf32>
    %392 = arith.addf %390, %391 : vector<8x128xf32>
    %393 = arith.mulf %382, %356 : vector<8x128xf32>
    %394 = arith.mulf %374, %384 : vector<8x128xf32>
    %395 = arith.addf %393, %394 : vector<8x128xf32>
    %396 = math.tanh %395 : vector<8x128xf32>
    %397 = arith.mulf %392, %396 : vector<8x128xf32>
    %398 = arith.index_cast %c7_i32 : i32 to index
    %c0_132 = arith.constant 0 : index
    %c0_133 = arith.constant 0 : index
    %399 = vector.load %arg6[%398, %c0_132, %c0_133] : memref<8x8x128xf32, #tpu.memory_space<vmem>>, vector<1x8x128xf32>
    %400 = vector.shape_cast %399 : vector<1x8x128xf32> to vector<8x128xf32>
    %401 = vector.shape_cast %397 : vector<8x128xf32> to vector<1x8x128xf32>
    tpu.vector_store %arg6[%398, %c0_132, %c0_133], %401 {strides = array<i32>} : memref<8x8x128xf32, #tpu.memory_space<vmem>>, vector<1x8x128xf32>,
    %402 = vector.broadcast %360 : i32 to vector<8x128xi32>
    %403 = arith.cmpi slt, %11, %402 : vector<8x128xi32>
    %404 = arith.select %403, %397, %355 : vector<8x128xi1>, vector<8x128xf32>
    %405 = arith.select %403, %395, %356 : vector<8x128xi1>, vector<8x128xf32>
    %c8_i32_134 = arith.constant 8 : i32
    %c0_135 = arith.constant 0 : index
    %c0_136 = arith.constant 0 : index
    %406 = vector.load %arg10[%c0_135, %c0_136] : memref<8x128xf32, #tpu.memory_space<vmem>>, vector<8x128xf32>
    tpu.vector_store %arg10[%c0_135, %c0_136], %404 {strides = array<i32>} : memref<8x128xf32, #tpu.memory_space<vmem>>, vector<8x128xf32>,
    %c0_137 = arith.constant 0 : index
    %c0_138 = arith.constant 0 : index
    %407 = vector.load %arg11[%c0_137, %c0_138] : memref<8x128xf32, #tpu.memory_space<vmem>>, vector<8x128xf32>
    tpu.vector_store %arg11[%c0_137, %c0_138], %405 {strides = array<i32>} : memref<8x128xf32, #tpu.memory_space<vmem>>, vector<8x128xf32>,
    %c0_i32_139 = arith.constant 0 : i32
    %408 = arith.cmpi eq, %arg0, %c0_i32_139 : i32
    %409 = arith.extui %408 : i1 to i32
    %c0_i32_140 = arith.constant 0 : i32
    %410 = arith.cmpi ne, %409, %c0_i32_140 : i32
    scf.if %410 {
      %c0_141 = arith.constant 0 : index
      %c0_142 = arith.constant 0 : index
      %411 = vector.load %arg7[%c0_141, %c0_142] : memref<8x128xf32, #tpu.memory_space<vmem>>, vector<8x128xf32>
      tpu.vector_store %arg7[%c0_141, %c0_142], %404 {strides = array<i32>} : memref<8x128xf32, #tpu.memory_space<vmem>>, vector<8x128xf32>,
      %c0_143 = arith.constant 0 : index
      %c0_144 = arith.constant 0 : index
      %412 = vector.load %arg8[%c0_143, %c0_144] : memref<8x128xf32, #tpu.memory_space<vmem>>, vector<8x128xf32>
      tpu.vector_store %arg8[%c0_143, %c0_144], %405 {strides = array<i32>} : memref<8x128xf32, #tpu.memory_space<vmem>>, vector<8x128xf32>,
    } else {
    }
    return
  }
  func.func @transform_0(%arg0: i32, %arg1: memref<8xi32, #tpu.memory_space<smem>>) -> (i32, i32) {
    %c0_i32 = arith.constant 0 : i32
    %c0_i32_0 = arith.constant 0 : i32
    return %arg0, %c0_i32 : i32, i32
  }
  func.func @transform_1(%arg0: i32, %arg1: memref<8xi32, #tpu.memory_space<smem>>) -> (i32, i32) {
    %c0_i32 = arith.constant 0 : i32
    %c0_i32_0 = arith.constant 0 : i32
    %c0_i32_1 = arith.constant 0 : i32
    return %c0_i32, %c0_i32_0 : i32, i32
  }
  func.func @transform_2(%arg0: i32, %arg1: memref<8xi32, #tpu.memory_space<smem>>) -> (i32, i32) {
    %c0_i32 = arith.constant 0 : i32
    %c0_i32_0 = arith.constant 0 : i32
    %c0_i32_1 = arith.constant 0 : i32
    return %c0_i32, %c0_i32_0 : i32, i32
  }
  func.func @transform_3(%arg0: i32, %arg1: memref<8xi32, #tpu.memory_space<smem>>) -> (i32, i32) {
    %c0_i32 = arith.constant 0 : i32
    %c0_i32_0 = arith.constant 0 : i32
    %c0_i32_1 = arith.constant 0 : i32
    return %c0_i32, %c0_i32_0 : i32, i32
  }
  func.func @transform_4(%arg0: i32, %arg1: memref<8xi32, #tpu.memory_space<smem>>) -> (i32, i32, i32) {
    %c0_i32 = arith.constant 0 : i32
    %c0_i32_0 = arith.constant 0 : i32
    %c0_i32_1 = arith.constant 0 : i32
    return %arg0, %c0_i32, %c0_i32_0 : i32, i32, i32
  }
  func.func @transform_5(%arg0: i32, %arg1: memref<8xi32, #tpu.memory_space<smem>>) -> (i32, i32) {
    %c0_i32 = arith.constant 0 : i32
    %c0_i32_0 = arith.constant 0 : i32
    %c0_i32_1 = arith.constant 0 : i32
    return %c0_i32, %c0_i32_0 : i32, i32
  }
  func.func @transform_6(%arg0: i32, %arg1: memref<8xi32, #tpu.memory_space<smem>>) -> (i32, i32) {
    %c0_i32 = arith.constant 0 : i32
    %c0_i32_0 = arith.constant 0 : i32
    %c0_i32_1 = arith.constant 0 : i32
    return %c0_i32, %c0_i32_0 : i32, i32
  }
}

</mosaic_0001>

<bundles_post_ra>
// kernel: tpu_custom_call.1
= control target key start
LH: loop header
LB: loop body
LE: loop exit
PB: predicated region body
PF: predicated region fallthrough
CT: control target
= control target key end

     0   :  { %s3375_s0 = inlined_call_operand.vmem [shape: s32[8], index: 0, kind: input, shape index: {}]   ;;  %s3376_s1 = inlined_call_operand.vmem [shape: f32[64,32], index: 1, kind: input, shape index: {}]   ;;  %s3377_s2 = inlined_call_operand.hbm [shape: f32[32,512], index: 2, kind: input, shape index: {}]   ;;  %s3378_s3 = inlined_call_operand.hbm [shape: f32[128,512], index: 3, kind: input, shape index: {}]   ;;  %s3379_s4 = inlined_call_operand.vmem [shape: f32[1,512], index: 4, kind: input, shape index: {}]   ;;  %s3380_s5 = inlined_call_operand.hbm [shape: f32[8,8,128], index: 5, kind: output, shape index: {0}]   ;;  %s3381_s6 = inlined_call_operand.hbm [shape: f32[8,128], index: 6, kind: output, shape index: {1}]   ;;  %s3382_s7 = inlined_call_operand.hbm [shape: f32[8,128], index: 7, kind: output, shape index: {2}]  }
   0x1   :  { %s13_s26 = sshll.u32 %s3375_s0, 4  ;;  %s14_s26 = int_to_ptr.vmem [resolvable:$true] %s13_s26 }
   0x2   :  { %s2130_s27 = scalar_lea.vmem %s14_s26, 16  ;;  %p2135_p1 = scmp.lt.s32.totalorder %s14_s26, %s14_s26 }
   0x3   :  { %p2131_p0 = scmp.ne.s32.totalorder %s14_s26, %s2130_s27  ;;  %p2136_p2 = scmp.lt.s32.totalorder %s2130_s27, %s2130_s27 }
   0x5   :  { %p2137_p3 = por %p2136_p2, %p2135_p1 }
   0x7   :  { %p2138_p4 = pnand %p2137_p3, %p2131_p0 }
   0x9   :  { %2141 = shalt.err (!%p2138_p4)  }
   0xa   :  { %s2252_s28 = smov [#allocation6]  }
   0xb   :  { %16 = dma.vmem_to_smem %s14_s26, 16, %s2252_s28, [#allocation5] }
   0xc   :  { %2242 = dma.done.wait [#allocation5], 16 }
   0xd   :  { %2243 = vsyncadd [#allocation5], 4294967280 }
   0xe   :  { %18 = sfence }
   0xf   :  { %19 = vsyncpa [#allocation8], 0 }
  0x10   :  { %20 = vsyncpa [#allocation11], 0 }
  0x11   :  { %21 = vsyncpa [#allocation9], 0 }
  0x12   :  { %22 = vsyncpa [#allocation14], 0  ;;  %s2253_s29 = smov [#allocation7]  }
  0x13   :  { %s30_s30 = sshll.u32 %s2253_s29, 4  ;;  %s31_s30 = int_to_ptr.vmem [resolvable:$true] %s30_s30 }
  0x14   :  { %s2150_s0 = scalar_lea.vmem %s31_s30, 2048  ;;  %p2155_p6 = scmp.lt.s32.totalorder %s31_s30, %s31_s30 }
  0x15   :  { %p2151_p5 = scmp.ne.s32.totalorder %s31_s30, %s2150_s0  ;;  %p2156_p7 = scmp.lt.s32.totalorder %s2150_s0, %s2150_s0 }
  0x17   :  { %p2157_p8 = por %p2156_p7, %p2155_p6 }
  0x19   :  { %p2158_p9 = pnand %p2157_p8, %p2151_p5 }
  0x1b   :  { %2161 = shalt.err (!%p2158_p9)
}
  0x1c   :  { %s2254_s8 = smov 512   ;;  %s2255_s9 = smov 32  }
  0x1d   :  { %36 = dma.hbm_to_vmem [thread:$0]  %s3377_s2, 2048, %s31_s30, [#allocation8], %s2254_s8, %s2254_s8, %s2255_s9  }
  0x1e   :  { %s2256_s12 = smov [#allocation10]  }
  0x1f   :  { %s42_s13 = sshll.u32 %s2256_s12, 4  ;;  %s43_s13 = int_to_ptr.vmem [resolvable:$true] %s42_s13 }
  0x20   :  { %s2170_s14 = scalar_lea.vmem %s43_s13, 8192  ;;  %p2175_p11 = scmp.lt.s32.totalorder %s43_s13, %s43_s13 }
  0x21   :  { %p2171_p10 = scmp.ne.s32.totalorder %s43_s13, %s2170_s14  ;;  %p2176_p12 = scmp.lt.s32.totalorder %s2170_s14, %s2170_s14 }
  0x23   :  { %p2177_p13 = por %p2176_p12, %p2175_p11 }
  0x25   :  { %p2178_p0 = pnand %p2177_p13, %p2171_p10 }
  0x27   :  { %2181 = shalt.err (!%p2178_p0)
}
  0x28   :  { %48 = dma.hbm_to_vmem [thread:$0]  %s3378_s3, 8192, %s43_s13, [#allocation11], %s2254_s8, %s2254_s8, %s2255_s9  }
  0x29   :  { %2244 = dma.done.wait [#allocation8], 2048  }
  0x2a   :  { %2245 = vsyncadd [#allocation8], 4294965248 }
  0x2b   :  { %2246 = dma.done.wait [#allocation11], 8192  }
  0x2c   :  { %2247 = vsyncadd [#allocation11], 4294959104  ;;  %v3383_v0 = vmov 0.0   ;;  %v76_v1 = vld [vmem:[#allocation7 + $0x68] sm:$0xff]  ;;  %v78_v2 = vld [vmem:[#allocation7 + $0x78] sm:$0xff]  ;;  %vm109_vm0 = vcmask 261120  }
  0x2d   :  { %198 = vmatprep.mubr.f32.mxu0 %v3383_v0  ;;  %311 = vmatprep.mubr.f32.mxu1 %v3383_v0  ;;  %v75_v3 = vld [vmem:[#allocation7 + $0x60] sm:$0xff]  ;;  %v77_v4 = vld [vmem:[#allocation7 + $0x70] sm:$0xff]  ;;  %v72_v5 = vld [vmem:[#allocation7 + $0x48] sm:$0xff]  ;;  %s1966_s8 = sld [smem:[#allocation6 + $0x1]]  ;;  %s2258_s15 = smov [#allocation12]  }
  0x2e   :  { %158 = vmatprep.subr.mxu0 %v76_v1  ;;  %271 = vmatprep.subr.mxu1 %v78_v2  ;;  %v74_v6 = vld [vmem:[#allocation7 + $0x58] sm:$0xff]  ;;  %v71_v7 = vld [vmem:[#allocation7 + $0x40] sm:$0xff]  ;;  %v73_v8 = vld [vmem:[#allocation7 + $0x50] sm:$0xff]  ;;  %s1967_s9 = sld [smem:[#allocation6 + $0x2]]  ;;  %s1903_s16 = sshll.u32 %s2258_s15, 4  ;;  %s1904_s16 = int_to_ptr.vmem [resolvable:$true] %s1903_s16 }
  0x2f   :  { %159 = vmatpush1.msra.mxu0 %v75_v3  ;;  %272 = vmatpush1.msra.mxu1 %v77_v4  ;;  %v68_v9 = vld [vmem:[#allocation7 + $0x28] sm:$0xff]  ;;  %v70_v10 = vld [vmem:[#allocation7 + $0x38] sm:$0xff]  ;;  %v67_v11 = vld [vmem:[#allocation7 + $0x20] sm:$0xff]  ;;  %s1968_s10 = sld [smem:[#allocation6 + $0x3]]  ;;  %s2259_s2 = smov [#allocation13]  }
  0x30   :  { %160 = vmatprep.subr.mxu0 %v72_v5  ;;  %273 = vmatprep.subr.mxu1 %v74_v6  ;;  %v69_v12 = vld [vmem:[#allocation7 + $0x30] sm:$0xff]  ;;  %v64_v13 = vld [vmem:[#allocation7 + $0x8] sm:$0xff]  ;;  %v66_v14 = vld [vmem:[#allocation7 + $0x18] sm:$0xff]  ;;  %s1969_s11 = sld [smem:[#allocation6 + $0x4]]  ;;  %s1916_s3 = sshll.u32 %s2259_s2, 4  ;;  %s1917_s3 = int_to_ptr.vmem [resolvable:$true] %s1916_s3 }
  0x31   :  { %161 = vmatpush1.msra.mxu0 %v71_v7  ;;  %274 = vmatpush1.msra.mxu1 %v73_v8  ;;  %v63_v15 = vld [vmem:[#allocation7] sm:$0xff]  ;;  %v65_v16 = vld [vmem:[#allocation7 + $0x10] sm:$0xff]  ;;  %v2317_v18 = vld [vmem:[#allocation10 + $0x1e8] sm:$0xff]  ;;  %s1970_s12 = sld [smem:[#allocation6 + $0x5]]  ;;  %s2260_s17 = smov [#allocation15]  }
  0x32   :  { %162 = vmatprep.subr.mxu0 %v68_v9  ;;  %275 = vmatprep.subr.mxu1 %v70_v10  ;;  %v79_v17 = vld [vmem:[%s3376_s1] sm:$0xff]  ;;  %3483 = vst [vmem:[#allocation21_spill] sm:$0xff] %v2317_v18  ;;  %v2319_v19 = vld [vmem:[#allocation10 + $0x1f8] sm:$0xff]  ;;  %v2323_v21 = vld [vmem:[#allocation10 + $0x1f0] sm:$0xff]  ;;  %s1971_s13 = sld [smem:[#allocation6 + $0x6]]  ;;  %s1926_s18 = sshll.u32 %s2260_s17, 4  ;;  %s1927_s18 = int_to_ptr.vmem [resolvable:$true] %s1926_s18 }
  0x33   :  { %163 = vmatpush1.msra.mxu0 %v67_v11  ;;  %276 = vmatpush1.msra.mxu1 %v69_v12  ;;  %3484 = vst [vmem:[#allocation22_spill] sm:$0xff] %v2319_v19  ;;  %v2321_v20 = vld [vmem:[#allocation10 + $0x1e0] sm:$0xff]  ;;  %v2327_v22 = vld [vmem:[#allocation10 + $0x1c8] sm:$0xff]  ;;  %v2329_v23 = vld [vmem:[#allocation10 + $0x1d8] sm:$0xff]  ;;  %s1972_s14 = sld [smem:[#allocation6 + $0x7]]  ;;  %s2182_s19 = scalar_lea.vmem %s1904_s16, 1024 }
  0x34   :  { %164 = vmatprep.subr.mxu0 %v64_v13  ;;  %277 = vmatprep.subr.mxu1 %v66_v14  ;;  %v2335_v24 = vld [vmem:[#allocation10 + $0x1c0] sm:$0xff]  ;;  %v2337_v25 = vld [vmem:[#allocation10 + $0x1d0] sm:$0xff]  ;;  %v80_v26 = vld [vmem:[%s3376_s1 + $0x8] sm:$0xff]  ;;  %p2183_p1 = scmp.ne.s32.totalorder %s1904_s16, %s2182_s19  ;;  %p2187_p2 = scmp.lt.s32.totalorder %s1904_s16, %s1904_s16 }
  0x35   :  { %165 = vmatpush1.msra.mxu0 %v63_v15  ;;  %278 = vmatpush1.msra.mxu1 %v65_v16  ;;  %v2346_v27 = vld [vmem:[#allocation10 + $0x1a8] sm:$0xff]  ;;  %v2348_v28 = vld [vmem:[#allocation10 + $0x1b8] sm:$0xff]  ;;  %v2352_v29 = vld [vmem:[#allocation10 + $0x1a0] sm:$0xff]  ;;  %p2188_p3 = scmp.lt.s32.totalorder %s2182_s19, %s2182_s19 }
  0x36   :  { %1950 = vmatmul.mubr.msk.f32.vlgmr.msra.gmra.mxu0 %vm109_vm0, %v79_v17  ;;  %1958 = vmatmul.mubr.msk.f32.vlgmr.msra.gmra.mxu1 %vm109_vm0, %v79_v17  ;;  %v2354_v30 = vld [vmem:[#allocation10 + $0x1b0] sm:$0xff]  ;;  %v2358_v31 = vld [vmem:[#allocation10 + $0x188] sm:$0xff]  ;;  %v2360_v32 = vld [vmem:[#allocation10 + $0x198] sm:$0xff] }
  0x37   :  { %469 = vmatprep.subr.mxu0 %v2317_v18  ;;  %540 = vmatprep.subr.mxu1 %v2319_v19  ;;  %v2366_v33 = vld [vmem:[#allocation10 + $0x180] sm:$0xff]  ;;  %v2368_v34 = vld [vmem:[#allocation10 + $0x190] sm:$0xff]  ;;  %v2377_v36 = vld [vmem:[#allocation10 + $0x168] sm:$0xff]  ;;  %p2189_p4 = por %p2188_p3, %p2187_p2 }
  0x38   :  { %470 = vmatpush1.msra.mxu0 %v2321_v20  ;;  %541 = vmatpush1.msra.mxu1 %v2323_v21  ;;  %v81_v35 = vld [vmem:[%s3376_s1 + $0x10] sm:$0xff]  ;;  %v2379_v37 = vld [vmem:[#allocation10 + $0x178] sm:$0xff]  ;;  %v2383_v38 = vld [vmem:[#allocation10 + $0x160] sm:$0xff] }
  0x39   :  { %471 = vmatprep.subr.mxu0 %v2327_v22  ;;  %542 = vmatprep.subr.mxu1 %v2329_v23  ;;  %v2385_v39 = vld [vmem:[#allocation10 + $0x170] sm:$0xff]  ;;  %v2389_v40 = vld [vmem:[#allocation10 + $0x148] sm:$0xff]  ;;  %v2391_v41 = vld [vmem:[#allocation10 + $0x158] sm:$0xff]  ;;  %p2190_p5 = pnand %p2189_p4, %p2183_p1 }
  0x3a   :  { %204 = vmatprep.mubr.f32.mxu0 %v3383_v0  ;;  %317 = vmatprep.mubr.f32.mxu1 %v3383_v0  ;;  %v2397_v42 = vld [vmem:[#allocation10 + $0x140] sm:$0xff]  ;;  %v2399_v43 = vld [vmem:[#allocation10 + $0x150] sm:$0xff]  ;;  %v82_v44 = vld [vmem:[%s3376_s1 + $0x18] sm:$0xff] }
  0x3b   :  { %472 = vmatpush1.msra.mxu0 %v2335_v24  ;;  %543 = vmatpush1.msra.mxu1 %v2337_v25  ;;  %v2408_v45 = vld [vmem:[#allocation10 + $0x128] sm:$0xff]  ;;  %v2410_v46 = vld [vmem:[#allocation10 + $0x138] sm:$0xff]  ;;  %v2414_v47 = vld [vmem:[#allocation10 + $0x120] sm:$0xff] }
  0x3c   :  { %1951 = vmatmul.mubr.msk.f32.gmra.mxu0 %vm109_vm0, %v80_v26  ;;  %1959 = vmatmul.mubr.msk.f32.gmra.mxu1 %vm109_vm0, %v80_v26  ;;  %v2416_v48 = vld [vmem:[#allocation10 + $0x130] sm:$0xff]  ;;  %v2420_v49 = vld [vmem:[#allocation10 + $0x108] sm:$0xff]  ;;  %v2422_v50 = vld [vmem:[#allocation10 + $0x118] sm:$0xff] }
  0x3d   :  { %473 = vmatprep.subr.mxu0 %v2346_v27  ;;  %544 = vmatprep.subr.mxu1 %v2348_v28  ;;  %v2428_v51 = vld [vmem:[#allocation10 + $0x100] sm:$0xff]  ;;  %v2430_v52 = vld [vmem:[#allocation10 + $0x110] sm:$0xff]  ;;  %v2439_v54 = vld [vmem:[#allocation10 + $0xe8] sm:$0xff] }
  0x3e   :  { %474 = vmatpush1.msra.mxu0 %v2352_v29  ;;  %545 = vmatpush1.msra.mxu1 %v2354_v30  ;;  %v83_v53 = vld [vmem:[%s3376_s1 + $0x20] sm:$0xff]  ;;  %v2441_v55 = vld [vmem:[#allocation10 + $0xf8] sm:$0xff]  ;;  %v2447_v57 = vld [vmem:[#allocation10 + $0xf0] sm:$0xff] }
  0x3f   :  { %475 = vmatprep.subr.mxu0 %v2358_v31  ;;  %546 = vmatprep.subr.mxu1 %v2360_v32  ;;  %v2445_v56 = vld [vmem:[#allocation10 + $0xe0] sm:$0xff]  ;;  %v2451_v58 = vld [vmem:[#allocation10 + $0xc8] sm:$0xff]  ;;  %v2453_v59 = vld [vmem:[#allocation10 + $0xd8] sm:$0xff] }
  0x40   :  { %210 = vmatprep.mubr.f32.mxu0 %v3383_v0  ;;  %323 = vmatprep.mubr.f32.mxu1 %v3383_v0  ;;  %v2459_v60 = vld [vmem:[#allocation10 + $0xc0] sm:$0xff]  ;;  %v2461_v61 = vld [vmem:[#allocation10 + $0xd0] sm:$0xff]  ;;  %v84_v62 = vld [vmem:[%s3376_s1 + $0x28] sm:$0xff] }
  0x41   :  { %476 = vmatpush1.msra.mxu0 %v2366_v33  ;;  %547 = vmatpush1.msra.mxu1 %v2368_v34  ;;  %v2470_v63 = vld [vmem:[#allocation10 + $0xa8] sm:$0xff]  ;;  %v2472_v1 = vld [vmem:[#allocation10 + $0xb8] sm:$0xff]  ;;  %v2476_v2 = vld [vmem:[#allocation10 + $0xa0] sm:$0xff] }
  0x42   :  { %1952 = vmatmul.mubr.msk.f32.gmra.mxu0 %vm109_vm0, %v81_v35  ;;  %1960 = vmatmul.mubr.msk.f32.gmra.mxu1 %vm109_vm0, %v81_v35  ;;  %v2478_v3 = vld [vmem:[#allocation10 + $0xb0] sm:$0xff]  ;;  %v2482_v4 = vld [vmem:[#allocation10 + $0x88] sm:$0xff]  ;;  %v2484_v5 = vld [vmem:[#allocation10 + $0x98] sm:$0xff] }
  0x43   :  { %477 = vmatprep.subr.mxu0 %v2377_v36  ;;  %548 = vmatprep.subr.mxu1 %v2379_v37  ;;  %3485 = vst [vmem:[#allocation23_spill] sm:$0xff] %v2478_v3  ;;  %3486 = vst [vmem:[#allocation24_spill] sm:$0xff] %v2482_v4  ;;  %v2490_v6 = vld [vmem:[#allocation10 + $0x80] sm:$0xff]  ;;  %v2492_v7 = vld [vmem:[#allocation10 + $0x90] sm:$0xff] }
  0x44   :  { %478 = vmatpush1.msra.mxu0 %v2383_v38  ;;  %549 = vmatpush1.msra.mxu1 %v2385_v39  ;;  %3487 = vst [vmem:[#allocation25_spill] sm:$0xff] %v2484_v5  ;;  %3488 = vst [vmem:[#allocation26_spill] sm:$0xff] %v2490_v6  ;;  %v85_v8 = vld [vmem:[%s3376_s1 + $0x30] sm:$0xff]  ;;  %v2501_v9 = vld [vmem:[#allocation10 + $0x68] sm:$0xff] }
  0x45   :  { %479 = vmatprep.subr.mxu0 %v2389_v40  ;;  %550 = vmatprep.subr.mxu1 %v2391_v41  ;;  %3489 = vst [vmem:[#allocation27_spill] sm:$0xff] %v2492_v7  ;;  %3490 = vst [vmem:[#allocation28_spill] sm:$0xff] %v2501_v9  ;;  %v2503_v10 = vld [vmem:[#allocation10 + $0x78] sm:$0xff]  ;;  %v2507_v11 = vld [vmem:[#allocation10 + $0x60] sm:$0xff] }
  0x46   :  { %216 = vmatprep.mubr.f32.mxu0 %v3383_v0  ;;  %329 = vmatprep.mubr.f32.mxu1 %v3383_v0  ;;  %3491 = vst [vmem:[#allocation29_spill] sm:$0xff] %v2503_v10  ;;  %3492 = vst [vmem:[#allocation30_spill] sm:$0xff] %v2507_v11  ;;  %v2509_v12 = vld [vmem:[#allocation10 + $0x70] sm:$0xff]  ;;  %v2513_v13 = vld [vmem:[#allocation10 + $0x48] sm:$0xff] }
  0x47   :  { %480 = vmatpush1.msra.mxu0 %v2397_v42  ;;  %551 = vmatpush1.msra.mxu1 %v2399_v43  ;;  %3493 = vst [vmem:[#allocation31_spill] sm:$0xff] %v2509_v12  ;;  %3494 = vst [vmem:[#allocation32_spill] sm:$0xff] %v2513_v13  ;;  %v2515_v14 = vld [vmem:[#allocation10 + $0x58] sm:$0xff]  ;;  %v2521_v15 = vld [vmem:[#allocation10 + $0x40] sm:$0xff] }
  0x48   :  { %1953 = vmatmul.mubr.msk.f32.gmra.mxu0 %vm109_vm0, %v82_v44  ;;  %1961 = vmatmul.mubr.msk.f32.gmra.mxu1 %vm109_vm0, %v82_v44  ;;  %3495 = vst [vmem:[#allocation33_spill] sm:$0xff] %v2515_v14  ;;  %3496 = vst [vmem:[#allocation34_spill] sm:$0xff] %v2521_v15  ;;  %v2523_v16 = vld [vmem:[#allocation10 + $0x50] sm:$0xff]  ;;  %v86_v17 = vld [vmem:[%s3376_s1 + $0x38] sm:$0xff] }
  0x49   :  { %481 = vmatprep.subr.mxu0 %v2408_v45  ;;  %552 = vmatprep.subr.mxu1 %v2410_v46  ;;  %3497 = vst [vmem:[#allocation35_spill] sm:$0xff] %v2523_v16  ;;  %v2532_v26 = vld [vmem:[#allocation10 + $0x28] sm:$0xff]  ;;  %v2534_v35 = vld [vmem:[#allocation10 + $0x38] sm:$0xff]  ;;  %v2538_v44 = vld [vmem:[#allocation10 + $0x20] sm:$0xff] }
  0x4a   :  { %482 = vmatpush1.msra.mxu0 %v2414_v47  ;;  %553 = vmatpush1.msra.mxu1 %v2416_v48  ;;  %3498 = vst [vmem:[#allocation36_spill] sm:$0xff] %v2532_v26  ;;  %3499 = vst [vmem:[#allocation37_spill] sm:$0xff] %v2534_v35 }
  0x4b   :  { %483 = vmatprep.subr.mxu0 %v2420_v49  ;;  %554 = vmatprep.subr.mxu1 %v2422_v50  ;;  %3500 = vst [vmem:[#allocation38_spill] sm:$0xff] %v2538_v44 }
  0x4c   :  { %222 = vmatprep.mubr.f32.mxu0 %v3383_v0  ;;  %335 = vmatprep.mubr.f32.mxu1 %v3383_v0 }
  0x4d   :  { %484 = vmatpush1.msra.mxu0 %v2428_v51  ;;  %555 = vmatpush1.msra.mxu1 %v2430_v52 }
  0x4e   :  { %1954 = vmatmul.mubr.msk.f32.gmra.mxu0 %vm109_vm0, %v83_v53  ;;  %1962 = vmatmul.mubr.msk.f32.gmra.mxu1 %vm109_vm0, %v83_v53  ;;  %v2540_v53 = vld [vmem:[#allocation10 + $0x30] sm:$0xff] }
  0x4f   :  { %485 = vmatprep.subr.mxu0 %v2439_v54  ;;  %556 = vmatprep.subr.mxu1 %v2441_v55  ;;  %3501 = vst [vmem:[#allocation39_spill] sm:$0xff] %v2540_v53 }
  0x50   :  { %486 = vmatpush1.msra.mxu0 %v2445_v56  ;;  %557 = vmatpush1.msra.mxu1 %v2447_v57 }
  0x51   :  { %487 = vmatprep.subr.mxu0 %v2451_v58  ;;  %558 = vmatprep.subr.mxu1 %v2453_v59 }
  0x52   :  { %228 = vmatprep.mubr.f32.mxu0 %v3383_v0  ;;  %341 = vmatprep.mubr.f32.mxu1 %v3383_v0 }
  0x53   :  { %488 = vmatpush1.msra.mxu0 %v2459_v60  ;;  %559 = vmatpush1.msra.mxu1 %v2461_v61 }
  0x54   :  { %1955 = vmatmul.mubr.msk.f32.gmra.mxu0 %vm109_vm0, %v84_v62  ;;  %1963 = vmatmul.mubr.msk.f32.gmra.mxu1 %vm109_vm0, %v84_v62  ;;  %v2544_v62 = vld [vmem:[#allocation10 + $0x8] sm:$0xff] }
  0x55   :  { %489 = vmatprep.subr.mxu0 %v2470_v63  ;;  %560 = vmatprep.subr.mxu1 %v2472_v1  ;;  %3502 = vst [vmem:[#allocation40_spill] sm:$0xff] %v2544_v62 }
  0x56   :  { %490 = vmatpush1.msra.mxu0 %v2476_v2  ;;  %561 = vmatpush1.msra.mxu1 %v2478_v3 }
  0x57   :  { %491 = vmatprep.subr.mxu0 %v2482_v4  ;;  %562 = vmatprep.subr.mxu1 %v2484_v5 }
  0x58   :  { %234 = vmatprep.mubr.f32.mxu0 %v3383_v0  ;;  %347 = vmatprep.mubr.f32.mxu1 %v3383_v0 }
  0x59   :  { %492 = vmatpush1.msra.mxu0 %v2490_v6  ;;  %563 = vmatpush1.msra.mxu1 %v2492_v7 }
  0x5a   :  { %1956 = vmatmul.mubr.msk.f32.gmra.mxu0 %vm109_vm0, %v85_v8  ;;  %1964 = vmatmul.mubr.msk.f32.gmra.mxu1 %vm109_vm0, %v85_v8  ;;  %v2546_v8 = vld [vmem:[#allocation10 + $0x18] sm:$0xff] }
  0x5b   :  { %493 = vmatprep.subr.mxu0 %v2501_v9  ;;  %564 = vmatprep.subr.mxu1 %v2503_v10  ;;  %3503 = vst [vmem:[#allocation41_spill] sm:$0xff] %v2546_v8 }
  0x5c   :  { %494 = vmatpush1.msra.mxu0 %v2507_v11  ;;  %565 = vmatpush1.msra.mxu1 %v2509_v12 }
  0x5d   :  { %495 = vmatprep.subr.mxu0 %v2513_v13  ;;  %566 = vmatprep.subr.mxu1 %v2515_v14 }
  0x5e   :  { %240 = vmatprep.mubr.f32.mxu0 %v3383_v0  ;;  %353 = vmatprep.mubr.f32.mxu1 %v3383_v0  ;;  %v2550_v0 = vld [vmem:[#allocation10] sm:$0xff] }
  0x5f   :  { %496 = vmatpush1.msra.mxu0 %v2521_v15  ;;  %567 = vmatpush1.msra.mxu1 %v2523_v16  ;;  %3504 = vst [vmem:[#allocation42_spill] sm:$0xff] %v2550_v0  ;;  %v2554_v16 = vld [vmem:[#allocation10 + $0x10] sm:$0xff] }
  0x60   :  { %1957 = vmatmul.mubr.msk.f32.gmra.mxu0 %vm109_vm0, %v86_v17  ;;  %1965 = vmatmul.mubr.msk.f32.gmra.mxu1 %vm109_vm0, %v86_v17  ;;  %3505 = vst [vmem:[#allocation43_spill] sm:$0xff] %v2554_v16  ;;  %v3506_v17 = vmov 0.0  }
  0x61   :  { %497 = vmatprep.subr.mxu0 %v2532_v26  ;;  %568 = vmatprep.subr.mxu1 %v2534_v35 }
  0x62   :  { %498 = vmatpush1.msra.mxu0 %v2538_v44  ;;  %569 = vmatpush1.msra.mxu1 %v2540_v53 }
  0x63   :  { %499 = vmatprep.subr.mxu0 %v2544_v62  ;;  %570 = vmatprep.subr.mxu1 %v2546_v8 }
  0x64   :  { %500 = vmatpush1.msra.mxu0 %v2550_v0  ;;  %533 = vmatprep.mubr.f32.mxu0 %v3506_v17 }
  0x65   :  { %571 = vmatpush1.msra.mxu1 %v2554_v16  ;;  %604 = vmatprep.mubr.f32.mxu1 %v3506_v17 }
  0x66   :  { %534 = vmatmul.mubr.f32.vlgmr.msra.gmra.mxu0 %v3506_v17  ;;  %605 = vmatmul.mubr.f32.vlgmr.msra.gmra.mxu1 %v3506_v17 }
  0x67   :  { %647 = vmatprep.subr.mxu0 %v2317_v18  ;;  %718 = vmatprep.subr.mxu1 %v2319_v19 }
  0x68   :  { %648 = vmatpush1.msra.mxu0 %v2321_v20  ;;  %719 = vmatpush1.msra.mxu1 %v2323_v21 }
  0x69   :  { %649 = vmatprep.subr.mxu0 %v2327_v22  ;;  %720 = vmatprep.subr.mxu1 %v2329_v23 }
  0x6a   :  { %650 = vmatpush1.msra.mxu0 %v2335_v24  ;;  %721 = vmatpush1.msra.mxu1 %v2337_v25 }
  0x6b   :  { %651 = vmatprep.subr.mxu0 %v2346_v27  ;;  %722 = vmatprep.subr.mxu1 %v2348_v28 }
  0x6c   :  { %652 = vmatpush1.msra.mxu0 %v2352_v29  ;;  %723 = vmatpush1.msra.mxu1 %v2354_v30 }
  0x6d   :  { %653 = vmatprep.subr.mxu0 %v2358_v31  ;;  %724 = vmatprep.subr.mxu1 %v2360_v32 }
  0x6e   :  { %654 = vmatpush1.msra.mxu0 %v2366_v33  ;;  %725 = vmatpush1.msra.mxu1 %v2368_v34 }
  0x6f   :  { %655 = vmatprep.subr.mxu0 %v2377_v36  ;;  %726 = vmatprep.subr.mxu1 %v2379_v37 }
  0x70   :  { %656 = vmatpush1.msra.mxu0 %v2383_v38  ;;  %727 = vmatpush1.msra.mxu1 %v2385_v39 }
  0x71   :  { %657 = vmatprep.subr.mxu0 %v2389_v40  ;;  %728 = vmatprep.subr.mxu1 %v2391_v41 }
  0x72   :  { %658 = vmatpush1.msra.mxu0 %v2397_v42  ;;  %729 = vmatpush1.msra.mxu1 %v2399_v43 }
  0x73   :  { %659 = vmatprep.subr.mxu0 %v2408_v45  ;;  %730 = vmatprep.subr.mxu1 %v2410_v46 }
  0x74   :  { %660 = vmatpush1.msra.mxu0 %v2414_v47  ;;  %731 = vmatpush1.msra.mxu1 %v2416_v48 }
  0x75   :  { %661 = vmatprep.subr.mxu0 %v2420_v49  ;;  %732 = vmatprep.subr.mxu1 %v2422_v50 }
  0x76   :  { %662 = vmatpush1.msra.mxu0 %v2428_v51  ;;  %733 = vmatpush1.msra.mxu1 %v2430_v52 }
  0x77   :  { %663 = vmatprep.subr.mxu0 %v2439_v54  ;;  %734 = vmatprep.subr.mxu1 %v2441_v55 }
  0x78   :  { %664 = vmatpush1.msra.mxu0 %v2445_v56  ;;  %735 = vmatpush1.msra.mxu1 %v2447_v57 }
  0x79   :  { %665 = vmatprep.subr.mxu0 %v2451_v58  ;;  %736 = vmatprep.subr.mxu1 %v2453_v59 }
  0x7a   :  { %666 = vmatpush1.msra.mxu0 %v2459_v60  ;;  %737 = vmatpush1.msra.mxu1 %v2461_v61 }
  0x7b   :  { %667 = vmatprep.subr.mxu0 %v2470_v63  ;;  %738 = vmatprep.subr.mxu1 %v2472_v1 }
  0x7c   :  { %668 = vmatpush1.msra.mxu0 %v2476_v2  ;;  %739 = vmatpush1.msra.mxu1 %v2478_v3 }
  0x7d   :  { %669 = vmatprep.subr.mxu0 %v2482_v4  ;;  %740 = vmatprep.subr.mxu1 %v2484_v5  ;;  %v3507_v4 = vld [vmem:[#allocation35_spill] sm:$0xff] }
  0x7e   :  { %670 = vmatpush1.msra.mxu0 %v2490_v6  ;;  %741 = vmatpush1.msra.mxu1 %v2492_v7 }
  0x7f   :  { %671 = vmatprep.subr.mxu0 %v2501_v9  ;;  %742 = vmatprep.subr.mxu1 %v2503_v10 }
  0x80   :  { %672 = vmatpush1.msra.mxu0 %v2507_v11  ;;  %743 = vmatpush1.msra.mxu1 %v2509_v12 }
  0x81   :  { %673 = vmatprep.subr.mxu0 %v2513_v13  ;;  %744 = vmatprep.subr.mxu1 %v2515_v14 }
  0x82   :  { %674 = vmatpush1.msra.mxu0 %v2521_v15  ;;  %745 = vmatpush1.msra.mxu1 %v3507_v4 }
  0x83   :  { %675 = vmatprep.subr.mxu0 %v2532_v26  ;;  %746 = vmatprep.subr.mxu1 %v2534_v35  ;;  %v89_v35 = vlaneseq }
  0x84   :  { %676 = vmatpush1.msra.mxu0 %v2538_v44  ;;  %747 = vmatpush1.msra.mxu1 %v2540_v53 }
  0x85   :  { %677 = vmatprep.subr.mxu0 %v2544_v62  ;;  %748 = vmatprep.subr.mxu1 %v2546_v8  ;;  %v2632_v44 = vshrl.u32 %v89_v35, 7 }
  0x86   :  { %678 = vmatpush1.msra.mxu0 %v2550_v0  ;;  %711 = vmatprep.mubr.f32.mxu0 %v3506_v17 }
  0x87   :  { %749 = vmatpush1.msra.mxu1 %v2554_v16  ;;  %782 = vmatprep.mubr.f32.mxu1 %v3506_v17  ;;  %v91_v8 = vsub.s32 0, %v2632_v44  ;;  %v99_v0 = vsub.s32 2, %v2632_v44  ;;  %v87_v16 = vld [vmem:[%s3379_s4] sm:$0xf]  ;;  %v103_v35 = vsub.s32 3, %v2632_v44  ;;  %s461_s4 = sld [smem:[#allocation6]] }
  0x88   :  { %826 = vmatprep.subr.mxu0 %v2317_v18  ;;  %897 = vmatprep.subr.mxu1 %v2319_v19  ;;  %v95_v19 = vsub.s32 1, %v2632_v44 }
  0x89   :  { %v92_v26 = vrot.slane %v87_v16, %v91_v8  ;;  %v2649_v4 = vrot.slane %v87_v16, %v99_v0  ;;  %v2651_v12 = vrot.slane %v87_v16, %v103_v35 }
  0x8a   :  { %v96_v13 = vrot.slane %v87_v16, %v95_v19 }
  0xf6   :  { %v2634_v53 = vpop.f32.mrf.mxu0  ;;  %v2636_v62 = vpop.f32.mrf.mxu1 }
  0xf8   :  { %v2643_v17 = vpop.f32.mrf.mxu0  ;;  %v2645_v18 = vpop.f32.mrf.mxu1 }
  0xfc   :  { %v206_v15 = vpop.f32.mrf.mxu0  ;;  %v319_v14 = vpop.f32.mrf.mxu1 }
  0xfd   :  { %v2653_v11 = vadd.f32 %v206_v15, %v92_v26  ;;  %v2656_v10 = vadd.f32 %v319_v14, %v2649_v4 }
  0xfe   :  { %v208_v9 = vpop.f32.mrf.mxu0  ;;  %v321_v7 = vpop.f32.mrf.mxu1 }
  0xff   :  { %3508 = vst [vmem:[#allocation44_spill] sm:$0xff] %v2653_v11  ;;  %3509 = vst [vmem:[#allocation45_spill] sm:$0xff] %v2656_v10  ;;  %v2658_v6 = vadd.f32 %v208_v9, %v96_v13  ;;  %v2661_v5 = vadd.f32 %v321_v7, %v2651_v12 }
 0x101   :  { %3510 = vst [vmem:[#allocation46_spill] sm:$0xff] %v2658_v6  ;;  %3511 = vst [vmem:[#allocation47_spill] sm:$0xff] %v2661_v5 }
 0x102   :  { %v212_v8 = vpop.f32.mrf.mxu0  ;;  %v325_v0 = vpop.f32.mrf.mxu1 }
 0x103   :  { %v2663_v3 = vadd.f32 %v212_v8, %v92_v26  ;;  %v2666_v19 = vadd.f32 %v325_v0, %v2649_v4 }
 0x104   :  { %v214_v16 = vpop.f32.mrf.mxu0  ;;  %v327_v15 = vpop.f32.mrf.mxu1 }
 0x105   :  { %3512 = vst [vmem:[#allocation48_spill] sm:$0xff] %v2663_v3  ;;  %3513 = vst [vmem:[#allocation49_spill] sm:$0xff] %v2666_v19  ;;  %v2668_v35 = vadd.f32 %v214_v16, %v96_v13  ;;  %v2671_v14 = vadd.f32 %v327_v15, %v2651_v12 }
 0x107   :  { %3514 = vst [vmem:[#allocation50_spill] sm:$0xff] %v2668_v35  ;;  %3515 = vst [vmem:[#allocation51_spill] sm:$0xff] %v2671_v14 }
 0x108   :  { %v218_v10 = vpop.f32.mrf.mxu0  ;;  %v331_v9 = vpop.f32.mrf.mxu1 }
 0x109   :  { %v2673_v6 = vadd.f32 %v218_v10, %v92_v26  ;;  %v2676_v7 = vadd.f32 %v331_v9, %v2649_v4 }
 0x10a   :  { %v220_v5 = vpop.f32.mrf.mxu0  ;;  %v333_v8 = vpop.f32.mrf.mxu1 }
 0x10b   :  { %3516 = vst [vmem:[#allocation52_spill] sm:$0xff] %v2673_v6  ;;  %3517 = vst [vmem:[#allocation53_spill] sm:$0xff] %v2676_v7  ;;  %v2678_v3 = vadd.f32 %v220_v5, %v96_v13  ;;  %v2681_v0 = vadd.f32 %v333_v8, %v2651_v12 }
 0x10d   :  { %3518 = vst [vmem:[#allocation54_spill] sm:$0xff] %v2678_v3  ;;  %3519 = vst [vmem:[#allocation55_spill] sm:$0xff] %v2681_v0 }
 0x10e   :  { %v224_v19 = vpop.f32.mrf.mxu0  ;;  %v337_v16 = vpop.f32.mrf.mxu1 }
 0x10f   :  { %v2683_v35 = vadd.f32 %v224_v19, %v92_v26  ;;  %v2686_v15 = vadd.f32 %v337_v16, %v2649_v4 }
 0x110   :  { %v226_v14 = vpop.f32.mrf.mxu0  ;;  %v339_v10 = vpop.f32.mrf.mxu1 }
 0x111   :  { %3520 = vst [vmem:[#allocation56_spill] sm:$0xff] %v2683_v35  ;;  %3521 = vst [vmem:[#allocation57_spill] sm:$0xff] %v2686_v15  ;;  %v2688_v6 = vadd.f32 %v226_v14, %v96_v13  ;;  %v2691_v9 = vadd.f32 %v339_v10, %v2651_v12 }
 0x113   :  { %3522 = vst [vmem:[#allocation58_spill] sm:$0xff] %v2688_v6  ;;  %3523 = vst [vmem:[#allocation59_spill] sm:$0xff] %v2691_v9 }
 0x114   :  { %v230_v7 = vpop.f32.mrf.mxu0  ;;  %v343_v5 = vpop.f32.mrf.mxu1 }
 0x115   :  { %v2693_v3 = vadd.f32 %v230_v7, %v92_v26  ;;  %v2696_v8 = vadd.f32 %v343_v5, %v2649_v4 }
 0x116   :  { %v232_v0 = vpop.f32.mrf.mxu0  ;;  %v345_v19 = vpop.f32.mrf.mxu1 }
 0x117   :  { %3524 = vst [vmem:[#allocation60_spill] sm:$0xff] %v2693_v3  ;;  %3525 = vst [vmem:[#allocation61_spill] sm:$0xff] %v2696_v8  ;;  %v2698_v35 = vadd.f32 %v232_v0, %v96_v13  ;;  %v2701_v16 = vadd.f32 %v345_v19, %v2651_v12 }
 0x119   :  { %3526 = vst [vmem:[#allocation62_spill] sm:$0xff] %v2698_v35  ;;  %3527 = vst [vmem:[#allocation63_spill] sm:$0xff] %v2701_v16 }
 0x11a   :  { %v236_v15 = vpop.f32.mrf.mxu0  ;;  %v349_v14 = vpop.f32.mrf.mxu1 }
 0x11b   :  { %v2703_v6 = vadd.f32 %v236_v15, %v92_v26  ;;  %v2706_v10 = vadd.f32 %v349_v14, %v2649_v4 }
 0x11c   :  { %v238_v9 = vpop.f32.mrf.mxu0  ;;  %v351_v7 = vpop.f32.mrf.mxu1 }
 0x11d   :  { %3528 = vst [vmem:[#allocation64_spill] sm:$0xff] %v2703_v6  ;;  %3529 = vst [vmem:[#allocation65_spill] sm:$0xff] %v2706_v10  ;;  %v2708_v3 = vadd.f32 %v238_v9, %v96_v13  ;;  %v2711_v5 = vadd.f32 %v351_v7, %v2651_v12  ;;  %v201_v9 = vadd.f32 %v2634_v53, %v92_v26 }
 0x11e   :  { %v203_v7 = vadd.f32 %v2643_v17, %v96_v13 }
 0x11f   :  { %3530 = vst [vmem:[#allocation66_spill] sm:$0xff] %v2708_v3  ;;  %3531 = vst [vmem:[#allocation67_spill] sm:$0xff] %v2711_v5 }
 0x120   :  { %v242_v8 = vpop.f32.mrf.mxu0  ;;  %v355_v0 = vpop.f32.mrf.mxu1 }
 0x121   :  { %v2713_v35 = vadd.f32 %v242_v8, %v92_v26  ;;  %v2716_v19 = vadd.f32 %v355_v0, %v2649_v4  ;;  %v314_v0 = vadd.f32 %v2636_v62, %v2649_v4  ;;  %v634_v4 = vstv %s461_s4 }
 0x122   :  { %v244_v16 = vpop.f32.mrf.mxu0  ;;  %v357_v15 = vpop.f32.mrf.mxu1  ;;  %vm2730_vm1 = vcmp.lt.s32.totalorder %v2632_v44, %v634_v4  ;;  %v3546_v4 = vld [vmem:[#allocation31_spill] sm:$0xff] }
 0x123   :  { %3532 = vst [vmem:[#allocation68_spill] sm:$0xff] %v2713_v35  ;;  %3533 = vst [vmem:[#allocation69_spill] sm:$0xff] %v2716_v19  ;;  %v2718_v6 = vadd.f32 %v244_v16, %v96_v13  ;;  %v2721_v14 = vadd.f32 %v357_v15, %v2651_v12  ;;  %v316_v15 = vadd.f32 %v2645_v18, %v2651_v12 }
 0x125   :  { %3534 = vst [vmem:[#allocation70_spill] sm:$0xff] %v2718_v6  ;;  %3535 = vst [vmem:[#allocation71_spill] sm:$0xff] %v2721_v14  ;;  %v3556_v14 = vld [vmem:[#allocation41_spill] sm:$0xff] }
 0x126   :  { %v535_v10 = vpop.f32.mrf.mxu0  ;;  %v606_v35 = vpop.f32.mrf.mxu1 }
 0x127   :  { %v611_v5 = vadd.f32 %v535_v10, %v201_v9  ;;  %v613_v16 = vadd.f32 %v606_v35, %v314_v0 }
 0x128   :  { %v537_v3 = vpop.f32.mrf.mxu0  ;;  %v608_v6 = vpop.f32.mrf.mxu1 }
 0x129   :  { %v615_v11 = vmul.f32 0.5, %v611_v5  ;;  %v612_v8 = vadd.f32 %v537_v3, %v203_v7  ;;  %v614_v26 = vadd.f32 %v608_v6, %v316_v15  ;;  %v3555_v15 = vld [vmem:[#allocation40_spill] sm:$0xff] }
 0x12b   :  { %1986 = vtanh.f32 %v615_v11  ;;  %v619_v19 = vmul.f32 0.5, %v612_v8  ;;  %v624_v13 = vmul.f32 0.5, %v614_v26  ;;  %v3538_v26 = vld [vmem:[#allocation23_spill] sm:$0xff] }
 0x12d   :  { %1988 = vtanh.f32 %v619_v19  ;;  %v3592_v19 = vld [vmem:[#allocation50_spill] sm:$0xff] }
 0x12e   :  { %1990 = vtanh.f32 %v613_v16 }
 0x12f   :  { %1992 = vtanh.f32 %v624_v13  ;;  %v3539_v13 = vld [vmem:[#allocation24_spill] sm:$0xff] }
 0x138   :  { %v1987_v53 = vpop.eup %1986 }
 0x139   :  { %v617_v17 = vmul.f32 0.5, %v1987_v53  ;;  %v3540_v53 = vld [vmem:[#allocation25_spill] sm:$0xff] }
 0x13a   :  { %v1989_v10 = vpop.eup %1988 }
 0x13b   :  { %v618_v3 = vadd.f32 0.5, %v617_v17  ;;  %v621_v5 = vmul.f32 0.5, %v1989_v10  ;;  %v1991_v11 = vpop.eup %1990  ;;  %v3541_v17 = vld [vmem:[#allocation26_spill] sm:$0xff]  ;;  %v3542_v10 = vld [vmem:[#allocation27_spill] sm:$0xff] }
 0x13c   :  { %v1993_v12 = vpop.eup %1992 }
 0x13d   :  { %v622_v9 = vadd.f32 0.5, %v621_v5  ;;  %v629_v35 = vmul.f32 %v1991_v11, %v618_v3  ;;  %v626_v7 = vmul.f32 0.5, %v1993_v12  ;;  %v3543_v3 = vld [vmem:[#allocation28_spill] sm:$0xff]  ;;  %v3544_v5 = vld [vmem:[#allocation29_spill] sm:$0xff] }
 0x13e   :  { %v3547_v11 = vld [vmem:[#allocation32_spill] sm:$0xff] }
 0x13f   :  { %v628_v62 = vmul.f32 0.0, %v622_v9  ;;  %v627_v8 = vadd.f32 0.5, %v626_v7  ;;  %v3545_v9 = vld [vmem:[#allocation30_spill] sm:$0xff]  ;;  %v3551_v12 = vld [vmem:[#allocation36_spill] sm:$0xff]  ;;  %v3552_v7 = vld [vmem:[#allocation37_spill] sm:$0xff] }
 0x141   :  { %v630_v18 = vadd.f32 %v629_v35, %v628_v62  ;;  %v3548_v62 = vld [vmem:[#allocation33_spill] sm:$0xff]  ;;  %v3549_v35 = vld [vmem:[#allocation34_spill] sm:$0xff] }
 0x143   :  { %1994 = vtanh.f32 %v630_v18  ;;  %v2736_v6 = vsel %vm2730_vm1, %v630_v18, 0.0  ;;  %v3550_v18 = vld [vmem:[#allocation35_spill] sm:$0xff] }
 0x150   :  { %v1995_v0 = vpop.eup %1994 }
 0x151   :  { %v2738_v16 = vmul.f32 %v1995_v0, %v627_v8  ;;  %v3553_v8 = vld [vmem:[#allocation38_spill] sm:$0xff]  ;;  %v3554_v0 = vld [vmem:[#allocation39_spill] sm:$0xff] }
 0x153   :  { %633 = vst [vmem:[#allocation12] sm:$0xff] %v2738_v16  ;;  %1973 = vmatmul.mubr.msk.f32.vlgmr.msra.gmra.mxu0 %vm2730_vm1, %v2738_v16  ;;  %1974 = vmatmul.mubr.msk.f32.vlgmr.msra.gmra.mxu1 %vm2730_vm1, %v2738_v16 }
 0x154   :  { %827 = vmatpush1.msra.mxu0 %v2321_v20  ;;  %898 = vmatpush1.msra.mxu1 %v2323_v21 }
 0x155   :  { %828 = vmatprep.subr.mxu0 %v2327_v22  ;;  %899 = vmatprep.subr.mxu1 %v2329_v23 }
 0x156   :  { %829 = vmatpush1.msra.mxu0 %v2335_v24  ;;  %900 = vmatpush1.msra.mxu1 %v2337_v25 }
 0x157   :  { %830 = vmatprep.subr.mxu0 %v2346_v27  ;;  %901 = vmatprep.subr.mxu1 %v2348_v28 }
 0x158   :  { %831 = vmatpush1.msra.mxu0 %v2352_v29  ;;  %902 = vmatpush1.msra.mxu1 %v2354_v30 }
 0x159   :  { %832 = vmatprep.subr.mxu0 %v2358_v31  ;;  %903 = vmatprep.subr.mxu1 %v2360_v32 }
 0x15a   :  { %833 = vmatpush1.msra.mxu0 %v2366_v33  ;;  %904 = vmatpush1.msra.mxu1 %v2368_v34 }
 0x15b   :  { %834 = vmatprep.subr.mxu0 %v2377_v36  ;;  %905 = vmatprep.subr.mxu1 %v2379_v37 }
 0x15c   :  { %835 = vmatpush1.msra.mxu0 %v2383_v38  ;;  %906 = vmatpush1.msra.mxu1 %v2385_v39 }
 0x15d   :  { %836 = vmatprep.subr.mxu0 %v2389_v40  ;;  %907 = vmatprep.subr.mxu1 %v2391_v41 }
 0x15e   :  { %837 = vmatpush1.msra.mxu0 %v2397_v42  ;;  %908 = vmatpush1.msra.mxu1 %v2399_v43 }
 0x15f   :  { %838 = vmatprep.subr.mxu0 %v2408_v45  ;;  %909 = vmatprep.subr.mxu1 %v2410_v46 }
 0x160   :  { %839 = vmatpush1.msra.mxu0 %v2414_v47  ;;  %910 = vmatpush1.msra.mxu1 %v2416_v48 }
 0x161   :  { %840 = vmatprep.subr.mxu0 %v2420_v49  ;;  %911 = vmatprep.subr.mxu1 %v2422_v50 }
 0x162   :  { %841 = vmatpush1.msra.mxu0 %v2428_v51  ;;  %912 = vmatpush1.msra.mxu1 %v2430_v52 }
 0x163   :  { %842 = vmatprep.subr.mxu0 %v2439_v54  ;;  %913 = vmatprep.subr.mxu1 %v2441_v55 }
 0x164   :  { %843 = vmatpush1.msra.mxu0 %v2445_v56  ;;  %914 = vmatpush1.msra.mxu1 %v2447_v57 }
 0x165   :  { %844 = vmatprep.subr.mxu0 %v2451_v58  ;;  %915 = vmatprep.subr.mxu1 %v2453_v59 }
 0x166   :  { %845 = vmatpush1.msra.mxu0 %v2459_v60  ;;  %916 = vmatpush1.msra.mxu1 %v2461_v61 }
 0x167   :  { %846 = vmatprep.subr.mxu0 %v2470_v63  ;;  %917 = vmatprep.subr.mxu1 %v2472_v1 }
 0x168   :  { %847 = vmatpush1.msra.mxu0 %v2476_v2  ;;  %918 = vmatpush1.msra.mxu1 %v3538_v26 }
 0x169   :  { %848 = vmatprep.subr.mxu0 %v3539_v13  ;;  %919 = vmatprep.subr.mxu1 %v3540_v53 }
 0x16a   :  { %849 = vmatpush1.msra.mxu0 %v3541_v17  ;;  %920 = vmatpush1.msra.mxu1 %v3542_v10 }
 0x16b   :  { %850 = vmatprep.subr.mxu0 %v3543_v3  ;;  %921 = vmatprep.subr.mxu1 %v3544_v5  ;;  %v3563_v5 = vld [vmem:[#allocation46_spill] sm:$0xff] }
 0x16c   :  { %851 = vmatpush1.msra.mxu0 %v3545_v9  ;;  %922 = vmatpush1.msra.mxu1 %v3546_v4  ;;  %v3557_v4 = vld [vmem:[#allocation42_spill] sm:$0xff] }
 0x16d   :  { %852 = vmatprep.subr.mxu0 %v3547_v11  ;;  %923 = vmatprep.subr.mxu1 %v3548_v62  ;;  %v3558_v11 = vmov 0.0   ;;  %v3559_v62 = vld [vmem:[#allocation43_spill] sm:$0xff] }
 0x16e   :  { %853 = vmatpush1.msra.mxu0 %v3549_v35  ;;  %924 = vmatpush1.msra.mxu1 %v3550_v18  ;;  %v3560_v18 = vld [vmem:[#allocation21_spill] sm:$0xff] }
 0x16f   :  { %854 = vmatprep.subr.mxu0 %v3551_v12  ;;  %925 = vmatprep.subr.mxu1 %v3552_v7  ;;  %v3561_v12 = vld [vmem:[#allocation22_spill] sm:$0xff] }
 0x170   :  { %855 = vmatpush1.msra.mxu0 %v3553_v8  ;;  %926 = vmatpush1.msra.mxu1 %v3554_v0  ;;  %v3562_v8 = vld [vmem:[#allocation44_spill] sm:$0xff] }
 0x171   :  { %856 = vmatprep.subr.mxu0 %v3555_v15  ;;  %927 = vmatprep.subr.mxu1 %v3556_v14 }
 0x172   :  { %857 = vmatpush1.msra.mxu0 %v3557_v4  ;;  %890 = vmatprep.mubr.f32.mxu0 %v3558_v11  ;;  %v3564_v4 = vld [vmem:[#allocation45_spill] sm:$0xff] }
 0x173   :  { %928 = vmatpush1.msra.mxu1 %v3559_v62  ;;  %961 = vmatprep.mubr.f32.mxu1 %v3558_v11  ;;  %v3565_v11 = vld [vmem:[#allocation47_spill] sm:$0xff] }
 0x174   :  { %1005 = vmatprep.subr.mxu0 %v3560_v18  ;;  %1076 = vmatprep.subr.mxu1 %v3561_v12 }
 0x213   :  { %v713_v7 = vpop.f32.mrf.mxu0  ;;  %v784_v0 = vpop.f32.mrf.mxu1 }
 0x214   :  { %v789_v35 = vadd.f32 %v713_v7, %v3562_v8  ;;  %v791_v3 = vadd.f32 %v784_v0, %v3564_v4 }
 0x215   :  { %v715_v9 = vpop.f32.mrf.mxu0  ;;  %v786_v62 = vpop.f32.mrf.mxu1 }
 0x216   :  { %v793_v15 = vmul.f32 0.5, %v789_v35  ;;  %v790_v14 = vadd.f32 %v715_v9, %v3563_v5  ;;  %v792_v17 = vadd.f32 %v786_v62, %v3565_v11 }
 0x218   :  { %1996 = vtanh.f32 %v793_v15  ;;  %v797_v10 = vmul.f32 0.5, %v790_v14  ;;  %v802_v18 = vmul.f32 0.5, %v792_v17  ;;  %v813_v15 = vstv %s1966_s8 }
 0x219   :  { %vm814_vm2 = vcmp.lt.s32.totalorder %v2632_v44, %v813_v15 }
 0x21a   :  { %1998 = vtanh.f32 %v797_v10 }
 0x21b   :  { %2000 = vtanh.f32 %v791_v3 }
 0x21c   :  { %2002 = vtanh.f32 %v802_v18 }
 0x225   :  { %v1997_v12 = vpop.eup %1996 }
 0x226   :  { %v795_v53 = vmul.f32 0.5, %v1997_v12  ;;  %v3594_v12 = vld [vmem:[#allocation51_spill] sm:$0xff] }
 0x227   :  { %v1999_v13 = vpop.eup %1998 }
 0x228   :  { %v796_v7 = vadd.f32 0.5, %v795_v53  ;;  %v799_v8 = vmul.f32 0.5, %v1999_v13  ;;  %v2001_v35 = vpop.eup %2000  ;;  %v3566_v13 = vsel %vm2730_vm1, %v2738_v16, 0.0  ;;  %v3593_v16 = vld [vmem:[#allocation49_spill] sm:$0xff] }
 0x229   :  { %v2003_v17 = vpop.eup %2002 }
 0x22a   :  { %v800_v26 = vadd.f32 0.5, %v799_v8  ;;  %v807_v5 = vmul.f32 %v2001_v35, %v796_v7  ;;  %v804_v3 = vmul.f32 0.5, %v2003_v17 }
 0x22c   :  { %v806_v9 = vmul.f32 %v800_v26, %v2736_v6  ;;  %v805_v4 = vadd.f32 0.5, %v804_v3 }
 0x22e   :  { %v808_v14 = vadd.f32 %v807_v5, %v806_v9 }
 0x230   :  { %2004 = vtanh.f32 %v808_v14  ;;  %v2823_v10 = vsel %vm814_vm2, %v808_v14, %v2736_v6 }
 0x23d   :  { %v2005_v11 = vpop.eup %2004 }
 0x23e   :  { %v810_v53 = vmul.f32 %v2005_v11, %v805_v4  ;;  %v992_v11 = vstv %s1967_s9 }
 0x23f   :  { %vm993_vm3 = vcmp.lt.s32.totalorder %v2632_v44, %v992_v11  ;;  %v2971_v11 = vld [vmem:[#allocation10 + $0x148] sm:$0xff] }
 0x240   :  { %812 = vst [vmem:[#allocation12 + $0x8] sm:$0xff] %v810_v53  ;;  %v2829_v62 = vsel %vm814_vm2, %v810_v53, %v3566_v13 }
 0x241   :  { %891 = vmatmul.mubr.f32.vlgmr.msra.gmra.mxu0 %v2829_v62  ;;  %962 = vmatmul.mubr.f32.vlgmr.msra.gmra.mxu1 %v2829_v62 }
 0x242   :  { %1006 = vmatpush1.msra.mxu0 %v2321_v20  ;;  %1077 = vmatpush1.msra.mxu1 %v2323_v21  ;;  %v3567_v20 = vld [vmem:[#allocation23_spill] sm:$0xff]  ;;  %v3568_v21 = vld [vmem:[#allocation24_spill] sm:$0xff] }
 0x243   :  { %1007 = vmatprep.subr.mxu0 %v2327_v22  ;;  %1078 = vmatprep.subr.mxu1 %v2329_v23  ;;  %v3569_v22 = vld [vmem:[#allocation25_spill] sm:$0xff]  ;;  %v3570_v23 = vld [vmem:[#allocation26_spill] sm:$0xff] }
 0x244   :  { %1008 = vmatpush1.msra.mxu0 %v2335_v24  ;;  %1079 = vmatpush1.msra.mxu1 %v2337_v25  ;;  %v3571_v24 = vld [vmem:[#allocation27_spill] sm:$0xff]  ;;  %v3572_v25 = vld [vmem:[#allocation28_spill] sm:$0xff] }
 0x245   :  { %1009 = vmatprep.subr.mxu0 %v2346_v27  ;;  %1080 = vmatprep.subr.mxu1 %v2348_v28  ;;  %v3573_v27 = vld [vmem:[#allocation29_spill] sm:$0xff]  ;;  %v3574_v28 = vld [vmem:[#allocation30_spill] sm:$0xff] }
 0x246   :  { %1010 = vmatpush1.msra.mxu0 %v2352_v29  ;;  %1081 = vmatpush1.msra.mxu1 %v2354_v30  ;;  %v3575_v29 = vld [vmem:[#allocation31_spill] sm:$0xff]  ;;  %v3576_v30 = vld [vmem:[#allocation32_spill] sm:$0xff] }
 0x247   :  { %1011 = vmatprep.subr.mxu0 %v2358_v31  ;;  %1082 = vmatprep.subr.mxu1 %v2360_v32  ;;  %v3577_v31 = vld [vmem:[#allocation33_spill] sm:$0xff]  ;;  %v3578_v32 = vld [vmem:[#allocation34_spill] sm:$0xff] }
 0x248   :  { %1012 = vmatpush1.msra.mxu0 %v2366_v33  ;;  %1083 = vmatpush1.msra.mxu1 %v2368_v34  ;;  %v3579_v33 = vld [vmem:[#allocation35_spill] sm:$0xff]  ;;  %v3580_v34 = vld [vmem:[#allocation36_spill] sm:$0xff] }
 0x249   :  { %1013 = vmatprep.subr.mxu0 %v2377_v36  ;;  %1084 = vmatprep.subr.mxu1 %v2379_v37  ;;  %v3581_v36 = vld [vmem:[#allocation37_spill] sm:$0xff]  ;;  %v3582_v37 = vld [vmem:[#allocation38_spill] sm:$0xff] }
 0x24a   :  { %1014 = vmatpush1.msra.mxu0 %v2383_v38  ;;  %1085 = vmatpush1.msra.mxu1 %v2385_v39  ;;  %v3583_v38 = vld [vmem:[#allocation39_spill] sm:$0xff]  ;;  %v3584_v39 = vld [vmem:[#allocation40_spill] sm:$0xff] }
 0x24b   :  { %1015 = vmatprep.subr.mxu0 %v2389_v40  ;;  %1086 = vmatprep.subr.mxu1 %v2391_v41  ;;  %v3585_v40 = vld [vmem:[#allocation41_spill] sm:$0xff]  ;;  %v3586_v41 = vld [vmem:[#allocation42_spill] sm:$0xff] }
 0x24c   :  { %1016 = vmatpush1.msra.mxu0 %v2397_v42  ;;  %1087 = vmatpush1.msra.mxu1 %v2399_v43  ;;  %v3587_v42 = vmov 0.0   ;;  %v3588_v43 = vld [vmem:[#allocation43_spill] sm:$0xff] }
 0x24d   :  { %1017 = vmatprep.subr.mxu0 %v2408_v45  ;;  %1088 = vmatprep.subr.mxu1 %v2410_v46  ;;  %v2897_v45 = vld [vmem:[#allocation10 + $0x1e8] sm:$0xff]  ;;  %v2900_v46 = vld [vmem:[#allocation10 + $0x1f8] sm:$0xff] }
 0x24e   :  { %1018 = vmatpush1.msra.mxu0 %v2414_v47  ;;  %1089 = vmatpush1.msra.mxu1 %v2416_v48  ;;  %3589 = vst [vmem:[#allocation21_spill] sm:$0xff] %v2897_v45  ;;  %3590 = vst [vmem:[#allocation22_spill] sm:$0xff] %v2900_v46  ;;  %v3591_v48 = vld [vmem:[#allocation48_spill] sm:$0xff] }
 0x24f   :  { %1019 = vmatprep.subr.mxu0 %v2420_v49  ;;  %1090 = vmatprep.subr.mxu1 %v2422_v50 }
 0x250   :  { %1020 = vmatpush1.msra.mxu0 %v2428_v51  ;;  %1091 = vmatpush1.msra.mxu1 %v2430_v52 }
 0x251   :  { %1021 = vmatprep.subr.mxu0 %v2439_v54  ;;  %1092 = vmatprep.subr.mxu1 %v2441_v55 }
 0x252   :  { %1022 = vmatpush1.msra.mxu0 %v2445_v56  ;;  %1093 = vmatpush1.msra.mxu1 %v2447_v57 }
 0x253   :  { %1023 = vmatprep.subr.mxu0 %v2451_v58  ;;  %1094 = vmatprep.subr.mxu1 %v2453_v59 }
 0x254   :  { %1024 = vmatpush1.msra.mxu0 %v2459_v60  ;;  %1095 = vmatpush1.msra.mxu1 %v2461_v61 }
 0x255   :  { %1025 = vmatprep.subr.mxu0 %v2470_v63  ;;  %1096 = vmatprep.subr.mxu1 %v2472_v1 }
 0x256   :  { %1026 = vmatpush1.msra.mxu0 %v2476_v2  ;;  %1097 = vmatpush1.msra.mxu1 %v3567_v20 }
 0x257   :  { %1027 = vmatprep.subr.mxu0 %v3568_v21  ;;  %1098 = vmatprep.subr.mxu1 %v3569_v22 }
 0x258   :  { %1028 = vmatpush1.msra.mxu0 %v3570_v23  ;;  %1099 = vmatpush1.msra.mxu1 %v3571_v24 }
 0x259   :  { %1029 = vmatprep.subr.mxu0 %v3572_v25  ;;  %1100 = vmatprep.subr.mxu1 %v3573_v27 }
 0x25a   :  { %1030 = vmatpush1.msra.mxu0 %v3574_v28  ;;  %1101 = vmatpush1.msra.mxu1 %v3575_v29 }
 0x25b   :  { %1031 = vmatprep.subr.mxu0 %v3576_v30  ;;  %1102 = vmatprep.subr.mxu1 %v3577_v31 }
 0x25c   :  { %1032 = vmatpush1.msra.mxu0 %v3578_v32  ;;  %1103 = vmatpush1.msra.mxu1 %v3579_v33 }
 0x25d   :  { %1033 = vmatprep.subr.mxu0 %v3580_v34  ;;  %1104 = vmatprep.subr.mxu1 %v3581_v36 }
 0x25e   :  { %1034 = vmatpush1.msra.mxu0 %v3582_v37  ;;  %1105 = vmatpush1.msra.mxu1 %v3583_v38 }
 0x25f   :  { %1035 = vmatprep.subr.mxu0 %v3584_v39  ;;  %1106 = vmatprep.subr.mxu1 %v3585_v40 }
 0x260   :  { %1036 = vmatpush1.msra.mxu0 %v3586_v41  ;;  %1069 = vmatprep.mubr.f32.mxu0 %v3587_v42 }
 0x261   :  { %1107 = vmatpush1.msra.mxu1 %v3588_v43  ;;  %1140 = vmatprep.mubr.f32.mxu1 %v3587_v42 }
 0x262   :  { %1184 = vmatprep.subr.mxu0 %v2897_v45  ;;  %1255 = vmatprep.subr.mxu1 %v2900_v46 }
 0x301   :  { %v892_v47 = vpop.f32.mrf.mxu0  ;;  %v963_v50 = vpop.f32.mrf.mxu1 }
 0x302   :  { %v968_v49 = vadd.f32 %v892_v47, %v3591_v48  ;;  %v970_v26 = vadd.f32 %v963_v50, %v3593_v16  ;;  %v2920_v16 = vld [vmem:[#allocation10 + $0x1f0] sm:$0xff] }
 0x303   :  { %v894_v51 = vpop.f32.mrf.mxu0  ;;  %v965_v18 = vpop.f32.mrf.mxu1 }
 0x304   :  { %v972_v52 = vmul.f32 0.5, %v968_v49  ;;  %v969_v6 = vadd.f32 %v894_v51, %v3592_v19  ;;  %v971_v7 = vadd.f32 %v965_v18, %v3594_v12  ;;  %v2935_v18 = vld [vmem:[#allocation10 + $0x1a8] sm:$0xff]  ;;  %v2938_v12 = vld [vmem:[#allocation10 + $0x1b8] sm:$0xff] }
 0x306   :  { %2006 = vtanh.f32 %v972_v52  ;;  %v976_v0 = vmul.f32 0.5, %v969_v6  ;;  %v981_v8 = vmul.f32 0.5, %v971_v7  ;;  %v2917_v6 = vld [vmem:[#allocation10 + $0x1e0] sm:$0xff] }
 0x307   :  { %v2941_v7 = vld [vmem:[#allocation10 + $0x1a0] sm:$0xff] }
 0x308   :  { %2008 = vtanh.f32 %v976_v0  ;;  %v2932_v0 = vld [vmem:[#allocation10 + $0x1d0] sm:$0xff] }
 0x309   :  { %2010 = vtanh.f32 %v970_v26  ;;  %v2926_v26 = vld [vmem:[#allocation10 + $0x1d8] sm:$0xff] }
 0x30a   :  { %2012 = vtanh.f32 %v981_v8  ;;  %v2944_v8 = vld [vmem:[#allocation10 + $0x1b0] sm:$0xff] }
 0x313   :  { %v2007_v35 = vpop.eup %2006 }
 0x314   :  { %v974_v5 = vmul.f32 0.5, %v2007_v35  ;;  %v2947_v35 = vld [vmem:[#allocation10 + $0x188] sm:$0xff] }
 0x315   :  { %v2009_v15 = vpop.eup %2008 }
 0x316   :  { %v975_v9 = vadd.f32 0.5, %v974_v5  ;;  %v978_v14 = vmul.f32 0.5, %v2009_v15  ;;  %v2011_v17 = vpop.eup %2010  ;;  %v2950_v5 = vld [vmem:[#allocation10 + $0x198] sm:$0xff]  ;;  %v2953_v15 = vld [vmem:[#allocation10 + $0x180] sm:$0xff] }
 0x317   :  { %v2013_v48 = vpop.eup %2012 }
 0x318   :  { %v979_v3 = vadd.f32 0.5, %v978_v14  ;;  %v986_v4 = vmul.f32 %v2011_v17, %v975_v9  ;;  %v983_v49 = vmul.f32 0.5, %v2013_v48  ;;  %v2956_v9 = vld [vmem:[#allocation10 + $0x190] sm:$0xff]  ;;  %v2959_v14 = vld [vmem:[#allocation10 + $0x168] sm:$0xff]  ;;  %v2962_v17 = vld [vmem:[#allocation10 + $0x178] sm:$0xff] }
 0x319   :  { %v2980_v48 = vld [vmem:[#allocation10 + $0x150] sm:$0xff] }
 0x31a   :  { %v985_v53 = vmul.f32 %v979_v3, %v2823_v10  ;;  %v984_v50 = vadd.f32 0.5, %v983_v49  ;;  %v2965_v3 = vld [vmem:[#allocation10 + $0x160] sm:$0xff]  ;;  %3596 = vst [vmem:[#allocation46_spill] sm:$0xff] %v2980_v48  ;;  %v2983_v49 = vld [vmem:[#allocation10 + $0x128] sm:$0xff] }
 0x31b   :  { %3597 = vst [vmem:[#allocation45_spill] sm:$0xff] %v2983_v49 }
 0x31c   :  { %v987_v13 = vadd.f32 %v986_v4, %v985_v53  ;;  %v2968_v4 = vld [vmem:[#allocation10 + $0x170] sm:$0xff]  ;;  %v2974_v53 = vld [vmem:[#allocation10 + $0x158] sm:$0xff] }
 0x31e   :  { %2014 = vtanh.f32 %v987_v13  ;;  %v2910_v47 = vsel %vm993_vm3, %v987_v13, %v2823_v10  ;;  %v2923_v10 = vld [vmem:[#allocation10 + $0x1c8] sm:$0xff]  ;;  %v2977_v13 = vld [vmem:[#allocation10 + $0x140] sm:$0xff] }
 0x31f   :  { %3595 = vst [vmem:[#allocation44_spill] sm:$0xff] %v2977_v13 }
 0x32b   :  { %v2015_v51 = vpop.eup %2014 }
 0x32c   :  { %v989_v52 = vmul.f32 %v2015_v51, %v984_v50  ;;  %v2986_v50 = vld [vmem:[#allocation10 + $0x138] sm:$0xff]  ;;  %v2989_v51 = vld [vmem:[#allocation10 + $0x120] sm:$0xff] }
 0x32d   :  { %3598 = vst [vmem:[#allocation47_spill] sm:$0xff] %v2986_v50 }
 0x32e   :  { %991 = vst [vmem:[#allocation12 + $0x10] sm:$0xff] %v989_v52  ;;  %v2913_v19 = vsel %vm993_vm3, %v989_v52, %v2829_v62  ;;  %v2929_v62 = vld [vmem:[#allocation10 + $0x1c0] sm:$0xff]  ;;  %v2992_v52 = vld [vmem:[#allocation10 + $0x130] sm:$0xff] }
 0x32f   :  { %1070 = vmatmul.mubr.f32.vlgmr.msra.gmra.mxu0 %v2913_v19  ;;  %1141 = vmatmul.mubr.f32.vlgmr.msra.gmra.mxu1 %v2913_v19 }
 0x330   :  { %1185 = vmatpush1.msra.mxu0 %v2917_v6  ;;  %1256 = vmatpush1.msra.mxu1 %v2920_v16 }
 0x331   :  { %1186 = vmatprep.subr.mxu0 %v2923_v10  ;;  %1257 = vmatprep.subr.mxu1 %v2926_v26 }
 0x332   :  { %1187 = vmatpush1.msra.mxu0 %v2929_v62  ;;  %1258 = vmatpush1.msra.mxu1 %v2932_v0 }
 0x333   :  { %1188 = vmatprep.subr.mxu0 %v2935_v18  ;;  %1259 = vmatprep.subr.mxu1 %v2938_v12 }
 0x334   :  { %1189 = vmatpush1.msra.mxu0 %v2941_v7  ;;  %1260 = vmatpush1.msra.mxu1 %v2944_v8 }
 0x335   :  { %1190 = vmatprep.subr.mxu0 %v2947_v35  ;;  %1261 = vmatprep.subr.mxu1 %v2950_v5 }
 0x336   :  { %1191 = vmatpush1.msra.mxu0 %v2953_v15  ;;  %1262 = vmatpush1.msra.mxu1 %v2956_v9 }
 0x337   :  { %1192 = vmatprep.subr.mxu0 %v2959_v14  ;;  %1263 = vmatprep.subr.mxu1 %v2962_v17 }
 0x338   :  { %1193 = vmatpush1.msra.mxu0 %v2965_v3  ;;  %1264 = vmatpush1.msra.mxu1 %v2968_v4 }
 0x339   :  { %1194 = vmatprep.subr.mxu0 %v2971_v11  ;;  %1265 = vmatprep.subr.mxu1 %v2974_v53 }
 0x33a   :  { %1195 = vmatpush1.msra.mxu0 %v2977_v13  ;;  %1266 = vmatpush1.msra.mxu1 %v2980_v48  ;;  %v2995_v13 = vld [vmem:[#allocation10 + $0x108] sm:$0xff]  ;;  %v2998_v48 = vld [vmem:[#allocation10 + $0x118] sm:$0xff] }
 0x33b   :  { %1196 = vmatprep.subr.mxu0 %v2983_v49  ;;  %1267 = vmatprep.subr.mxu1 %v2986_v50  ;;  %v3001_v49 = vld [vmem:[#allocation10 + $0x100] sm:$0xff]  ;;  %v3004_v50 = vld [vmem:[#allocation10 + $0x110] sm:$0xff] }
 0x33c   :  { %1197 = vmatpush1.msra.mxu0 %v2989_v51  ;;  %1268 = vmatpush1.msra.mxu1 %v2992_v52 }
 0x33d   :  { %1198 = vmatprep.subr.mxu0 %v2995_v13  ;;  %1269 = vmatprep.subr.mxu1 %v2998_v48 }
 0x33e   :  { %1199 = vmatpush1.msra.mxu0 %v3001_v49  ;;  %1270 = vmatpush1.msra.mxu1 %v3004_v50 }
 0x33f   :  { %1200 = vmatprep.subr.mxu0 %v2439_v54  ;;  %1271 = vmatprep.subr.mxu1 %v2441_v55  ;;  %v3599_v55 = vld [vmem:[#allocation52_spill] sm:$0xff] }
 0x340   :  { %1201 = vmatpush1.msra.mxu0 %v2445_v56  ;;  %1272 = vmatpush1.msra.mxu1 %v2447_v57 }
 0x341   :  { %1202 = vmatprep.subr.mxu0 %v2451_v58  ;;  %1273 = vmatprep.subr.mxu1 %v2453_v59 }
 0x342   :  { %1203 = vmatpush1.msra.mxu0 %v2459_v60  ;;  %1274 = vmatpush1.msra.mxu1 %v2461_v61  ;;  %v3600_v60 = vld [vmem:[#allocation54_spill] sm:$0xff] }
 0x343   :  { %1204 = vmatprep.subr.mxu0 %v2470_v63  ;;  %1275 = vmatprep.subr.mxu1 %v2472_v1  ;;  %v3601_v63 = vld [vmem:[#allocation53_spill] sm:$0xff] }
 0x344   :  { %1205 = vmatpush1.msra.mxu0 %v2476_v2  ;;  %1276 = vmatpush1.msra.mxu1 %v3567_v20 }
 0x345   :  { %1206 = vmatprep.subr.mxu0 %v3568_v21  ;;  %1277 = vmatprep.subr.mxu1 %v3569_v22  ;;  %v3602_v21 = vld [vmem:[#allocation55_spill] sm:$0xff] }
 0x346   :  { %1207 = vmatpush1.msra.mxu0 %v3570_v23  ;;  %1278 = vmatpush1.msra.mxu1 %v3571_v24 }
 0x347   :  { %1208 = vmatprep.subr.mxu0 %v3572_v25  ;;  %1279 = vmatprep.subr.mxu1 %v3573_v27 }
 0x348   :  { %1209 = vmatpush1.msra.mxu0 %v3574_v28  ;;  %1280 = vmatpush1.msra.mxu1 %v3575_v29 }
 0x349   :  { %1210 = vmatprep.subr.mxu0 %v3576_v30  ;;  %1281 = vmatprep.subr.mxu1 %v3577_v31 }
 0x34a   :  { %1211 = vmatpush1.msra.mxu0 %v3578_v32  ;;  %1282 = vmatpush1.msra.mxu1 %v3579_v33  ;;  %v1171_v33 = vstv %s1968_s10 }
 0x34b   :  { %1212 = vmatprep.subr.mxu0 %v3580_v34  ;;  %1283 = vmatprep.subr.mxu1 %v3581_v36  ;;  %vm1172_vm4 = vcmp.lt.s32.totalorder %v2632_v44, %v1171_v33  ;;  %v3147_v33 = vld [vmem:[#allocation10 + $0x48] sm:$0xff] }
 0x34c   :  { %1213 = vmatpush1.msra.mxu0 %v3582_v37  ;;  %1284 = vmatpush1.msra.mxu1 %v3583_v38  ;;  %3615 = vst [vmem:[#allocation31_spill] sm:$0xff] %v3147_v33 }
 0x34d   :  { %1214 = vmatprep.subr.mxu0 %v3584_v39  ;;  %1285 = vmatprep.subr.mxu1 %v3585_v40 }
 0x34e   :  { %1215 = vmatpush1.msra.mxu0 %v3586_v41  ;;  %1248 = vmatprep.mubr.f32.mxu0 %v3587_v42 }
 0x34f   :  { %1286 = vmatpush1.msra.mxu1 %v3588_v43  ;;  %1319 = vmatprep.mubr.f32.mxu1 %v3587_v42 }
 0x350   :  { %1363 = vmatprep.subr.mxu0 %v2897_v45  ;;  %1434 = vmatprep.subr.mxu1 %v2900_v46 }
 0x3ef   :  { %v1071_v54 = vpop.f32.mrf.mxu0  ;;  %v1142_v57 = vpop.f32.mrf.mxu1 }
 0x3f0   :  { %v1147_v56 = vadd.f32 %v1071_v54, %v3599_v55  ;;  %v1149_v1 = vadd.f32 %v1142_v57, %v3601_v63  ;;  %v3605_v55 = vld [vmem:[#allocation45_spill] sm:$0xff]  ;;  %v3087_v57 = vld [vmem:[#allocation10 + $0xe8] sm:$0xff]  ;;  %v3102_v63 = vld [vmem:[#allocation10 + $0xd8] sm:$0xff] }
 0x3f1   :  { %v1073_v58 = vpop.f32.mrf.mxu0  ;;  %v1144_v20 = vpop.f32.mrf.mxu1 }
 0x3f2   :  { %v1151_v59 = vmul.f32 0.5, %v1147_v56  ;;  %v1148_v61 = vadd.f32 %v1073_v58, %v3600_v60  ;;  %v1150_v22 = vadd.f32 %v1144_v20, %v3602_v21  ;;  %v3606_v56 = vld [vmem:[#allocation47_spill] sm:$0xff]  ;;  %v3090_v58 = vld [vmem:[#allocation10 + $0xf8] sm:$0xff]  ;;  %v3096_v60 = vld [vmem:[#allocation10 + $0xf0] sm:$0xff] }
 0x3f3   :  { %v3111_v20 = vld [vmem:[#allocation10 + $0xa8] sm:$0xff]  ;;  %v3114_v21 = vld [vmem:[#allocation10 + $0xb8] sm:$0xff] }
 0x3f4   :  { %2016 = vtanh.f32 %v1151_v59  ;;  %v1155_v2 = vmul.f32 0.5, %v1148_v61  ;;  %v1160_v23 = vmul.f32 0.5, %v1150_v22  ;;  %v3093_v59 = vld [vmem:[#allocation10 + $0xe0] sm:$0xff]  ;;  %v3099_v61 = vld [vmem:[#allocation10 + $0xc8] sm:$0xff] }
 0x3f5   :  { %v3117_v22 = vld [vmem:[#allocation10 + $0xa0] sm:$0xff] }
 0x3f6   :  { %2018 = vtanh.f32 %v1155_v2  ;;  %v3108_v2 = vld [vmem:[#allocation10 + $0xd0] sm:$0xff] }
 0x3f7   :  { %2020 = vtanh.f32 %v1149_v1  ;;  %v3105_v1 = vld [vmem:[#allocation10 + $0xc0] sm:$0xff] }
 0x3f8   :  { %2022 = vtanh.f32 %v1160_v23  ;;  %v3120_v23 = vld [vmem:[#allocation10 + $0xb0] sm:$0xff] }
 0x401   :  { %v2017_v24 = vpop.eup %2016 }
 0x402   :  { %v1153_v25 = vmul.f32 0.5, %v2017_v24  ;;  %v3123_v24 = vld [vmem:[#allocation10 + $0x88] sm:$0xff] }
 0x403   :  { %v2019_v27 = vpop.eup %2018  ;;  %3607 = vst [vmem:[#allocation23_spill] sm:$0xff] %v3123_v24 }
 0x404   :  { %v1154_v28 = vadd.f32 0.5, %v1153_v25  ;;  %v1157_v29 = vmul.f32 0.5, %v2019_v27  ;;  %v2021_v30 = vpop.eup %2020  ;;  %v3126_v25 = vld [vmem:[#allocation10 + $0x98] sm:$0xff]  ;;  %v3129_v27 = vld [vmem:[#allocation10 + $0x80] sm:$0xff] }
 0x405   :  { %v2023_v38 = vpop.eup %2022  ;;  %3608 = vst [vmem:[#allocation24_spill] sm:$0xff] %v3126_v25  ;;  %3609 = vst [vmem:[#allocation25_spill] sm:$0xff] %v3129_v27 }
 0x406   :  { %v1158_v31 = vadd.f32 0.5, %v1157_v29  ;;  %v1165_v32 = vmul.f32 %v2021_v30, %v1154_v28  ;;  %v1162_v39 = vmul.f32 0.5, %v2023_v38  ;;  %v3132_v28 = vld [vmem:[#allocation10 + $0x90] sm:$0xff]  ;;  %v3135_v29 = vld [vmem:[#allocation10 + $0x68] sm:$0xff]  ;;  %v3138_v30 = vld [vmem:[#allocation10 + $0x78] sm:$0xff] }
 0x407   :  { %3610 = vst [vmem:[#allocation26_spill] sm:$0xff] %v3132_v28  ;;  %3611 = vst [vmem:[#allocation27_spill] sm:$0xff] %v3135_v29  ;;  %v3156_v38 = vld [vmem:[#allocation10 + $0x50] sm:$0xff] }
 0x408   :  { %v1164_v34 = vmul.f32 %v1158_v31, %v2910_v47  ;;  %v1163_v40 = vadd.f32 0.5, %v1162_v39  ;;  %3612 = vst [vmem:[#allocation28_spill] sm:$0xff] %v3138_v30  ;;  %v3141_v31 = vld [vmem:[#allocation10 + $0x60] sm:$0xff]  ;;  %3618 = vst [vmem:[#allocation34_spill] sm:$0xff] %v3156_v38  ;;  %v3159_v39 = vld [vmem:[#allocation10 + $0x28] sm:$0xff] }
 0x409   :  { %3613 = vst [vmem:[#allocation29_spill] sm:$0xff] %v3141_v31  ;;  %3619 = vst [vmem:[#allocation35_spill] sm:$0xff] %v3159_v39 }
 0x40a   :  { %v1166_v36 = vadd.f32 %v1165_v32, %v1164_v34  ;;  %v3144_v32 = vld [vmem:[#allocation10 + $0x70] sm:$0xff]  ;;  %v3150_v34 = vld [vmem:[#allocation10 + $0x58] sm:$0xff] }
 0x40b   :  { %3614 = vst [vmem:[#allocation30_spill] sm:$0xff] %v3144_v32  ;;  %3616 = vst [vmem:[#allocation32_spill] sm:$0xff] %v3150_v34 }
 0x40c   :  { %2024 = vtanh.f32 %v1166_v36  ;;  %v3050_v37 = vsel %vm1172_vm4, %v1166_v36, %v2910_v47  ;;  %v3603_v47 = vld [vmem:[#allocation44_spill] sm:$0xff]  ;;  %v3153_v36 = vld [vmem:[#allocation10 + $0x40] sm:$0xff] }
 0x40d   :  { %3617 = vst [vmem:[#allocation33_spill] sm:$0xff] %v3153_v36 }
 0x419   :  { %v2025_v41 = vpop.eup %2024 }
 0x41a   :  { %v1168_v43 = vmul.f32 %v2025_v41, %v1163_v40  ;;  %v3162_v40 = vld [vmem:[#allocation10 + $0x38] sm:$0xff]  ;;  %v3165_v41 = vld [vmem:[#allocation10 + $0x20] sm:$0xff] }
 0x41b   :  { %3620 = vst [vmem:[#allocation36_spill] sm:$0xff] %v3162_v40  ;;  %3621 = vst [vmem:[#allocation37_spill] sm:$0xff] %v3165_v41 }
 0x41c   :  { %1170 = vst [vmem:[#allocation12 + $0x18] sm:$0xff] %v1168_v43  ;;  %v3053_v54 = vsel %vm1172_vm4, %v1168_v43, %v2913_v19  ;;  %v3604_v19 = vld [vmem:[#allocation46_spill] sm:$0xff]  ;;  %v3168_v43 = vld [vmem:[#allocation10 + $0x30] sm:$0xff] }
 0x41d   :  { %1249 = vmatmul.mubr.f32.vlgmr.msra.gmra.mxu0 %v3053_v54  ;;  %1320 = vmatmul.mubr.f32.vlgmr.msra.gmra.mxu1 %v3053_v54  ;;  %3622 = vst [vmem:[#allocation38_spill] sm:$0xff] %v3168_v43 }
 0x41e   :  { %1364 = vmatpush1.msra.mxu0 %v2917_v6  ;;  %1435 = vmatpush1.msra.mxu1 %v2920_v16 }
 0x41f   :  { %1365 = vmatprep.subr.mxu0 %v2923_v10  ;;  %1436 = vmatprep.subr.mxu1 %v2926_v26 }
 0x420   :  { %1366 = vmatpush1.msra.mxu0 %v2929_v62  ;;  %1437 = vmatpush1.msra.mxu1 %v2932_v0 }
 0x421   :  { %1367 = vmatprep.subr.mxu0 %v2935_v18  ;;  %1438 = vmatprep.subr.mxu1 %v2938_v12 }
 0x422   :  { %1368 = vmatpush1.msra.mxu0 %v2941_v7  ;;  %1439 = vmatpush1.msra.mxu1 %v2944_v8 }
 0x423   :  { %1369 = vmatprep.subr.mxu0 %v2947_v35  ;;  %1440 = vmatprep.subr.mxu1 %v2950_v5 }
 0x424   :  { %1370 = vmatpush1.msra.mxu0 %v2953_v15  ;;  %1441 = vmatpush1.msra.mxu1 %v2956_v9 }
 0x425   :  { %1371 = vmatprep.subr.mxu0 %v2959_v14  ;;  %1442 = vmatprep.subr.mxu1 %v2962_v17 }
 0x426   :  { %1372 = vmatpush1.msra.mxu0 %v2965_v3  ;;  %1443 = vmatpush1.msra.mxu1 %v2968_v4 }
 0x427   :  { %1373 = vmatprep.subr.mxu0 %v2971_v11  ;;  %1444 = vmatprep.subr.mxu1 %v2974_v53 }
 0x428   :  { %1374 = vmatpush1.msra.mxu0 %v3603_v47  ;;  %1445 = vmatpush1.msra.mxu1 %v3604_v19 }
 0x429   :  { %1375 = vmatprep.subr.mxu0 %v3605_v55  ;;  %1446 = vmatprep.subr.mxu1 %v3606_v56 }
 0x42a   :  { %1376 = vmatpush1.msra.mxu0 %v2989_v51  ;;  %1447 = vmatpush1.msra.mxu1 %v2992_v52 }
 0x42b   :  { %1377 = vmatprep.subr.mxu0 %v2995_v13  ;;  %1448 = vmatprep.subr.mxu1 %v2998_v48 }
 0x42c   :  { %1378 = vmatpush1.msra.mxu0 %v3001_v49  ;;  %1449 = vmatpush1.msra.mxu1 %v3004_v50 }
 0x42d   :  { %1379 = vmatprep.subr.mxu0 %v3087_v57  ;;  %1450 = vmatprep.subr.mxu1 %v3090_v58 }
 0x42e   :  { %1380 = vmatpush1.msra.mxu0 %v3093_v59  ;;  %1451 = vmatpush1.msra.mxu1 %v3096_v60 }
 0x42f   :  { %1381 = vmatprep.subr.mxu0 %v3099_v61  ;;  %1452 = vmatprep.subr.mxu1 %v3102_v63 }
 0x430   :  { %1382 = vmatpush1.msra.mxu0 %v3105_v1  ;;  %1453 = vmatpush1.msra.mxu1 %v3108_v2 }
 0x431   :  { %1383 = vmatprep.subr.mxu0 %v3111_v20  ;;  %1454 = vmatprep.subr.mxu1 %v3114_v21 }
 0x432   :  { %1384 = vmatpush1.msra.mxu0 %v3117_v22  ;;  %1455 = vmatpush1.msra.mxu1 %v3120_v23 }
 0x433   :  { %1385 = vmatprep.subr.mxu0 %v3123_v24  ;;  %1456 = vmatprep.subr.mxu1 %v3126_v25 }
 0x434   :  { %1386 = vmatpush1.msra.mxu0 %v3129_v27  ;;  %1457 = vmatpush1.msra.mxu1 %v3132_v28 }
 0x435   :  { %1387 = vmatprep.subr.mxu0 %v3135_v29  ;;  %1458 = vmatprep.subr.mxu1 %v3138_v30 }
 0x436   :  { %1388 = vmatpush1.msra.mxu0 %v3141_v31  ;;  %1459 = vmatpush1.msra.mxu1 %v3144_v32  ;;  %v3628_v32 = vld [vmem:[#allocation58_spill] sm:$0xff]  ;;  %v3629_v31 = vld [vmem:[#allocation57_spill] sm:$0xff] }
 0x437   :  { %1389 = vmatprep.subr.mxu0 %v3147_v33  ;;  %1460 = vmatprep.subr.mxu1 %v3150_v34 }
 0x438   :  { %1390 = vmatpush1.msra.mxu0 %v3153_v36  ;;  %1461 = vmatpush1.msra.mxu1 %v3156_v38  ;;  %v3171_v36 = vld [vmem:[#allocation10 + $0x8] sm:$0xff]  ;;  %v3174_v38 = vld [vmem:[#allocation10 + $0x18] sm:$0xff] }
 0x439   :  { %1391 = vmatprep.subr.mxu0 %v3159_v39  ;;  %1462 = vmatprep.subr.mxu1 %v3162_v40  ;;  %3623 = vst [vmem:[#allocation39_spill] sm:$0xff] %v3171_v36  ;;  %3624 = vst [vmem:[#allocation40_spill] sm:$0xff] %v3174_v38  ;;  %v3177_v39 = vld [vmem:[#allocation10] sm:$0xff]  ;;  %v3181_v40 = vld [vmem:[#allocation10 + $0x10] sm:$0xff] }
 0x43a   :  { %1392 = vmatpush1.msra.mxu0 %v3165_v41  ;;  %1463 = vmatpush1.msra.mxu1 %v3168_v43  ;;  %3625 = vst [vmem:[#allocation41_spill] sm:$0xff] %v3177_v39  ;;  %3626 = vst [vmem:[#allocation42_spill] sm:$0xff] %v3181_v40  ;;  %v3627_v43 = vld [vmem:[#allocation56_spill] sm:$0xff] }
 0x43b   :  { %1393 = vmatprep.subr.mxu0 %v3171_v36  ;;  %1464 = vmatprep.subr.mxu1 %v3174_v38 }
 0x43c   :  { %1394 = vmatpush1.msra.mxu0 %v3177_v39  ;;  %1427 = vmatprep.mubr.f32.mxu0 %v3587_v42 }
 0x43d   :  { %1465 = vmatpush1.msra.mxu1 %v3181_v40  ;;  %1498 = vmatprep.mubr.f32.mxu1 %v3587_v42  ;;  %v3630_v42 = vld [vmem:[#allocation59_spill] sm:$0xff] }
 0x43e   :  { %1542 = vmatprep.subr.mxu0 %v2897_v45  ;;  %1613 = vmatprep.subr.mxu1 %v2900_v46 }
 0x4dd   :  { %v1250_v36 = vpop.f32.mrf.mxu0  ;;  %v1321_v38 = vpop.f32.mrf.mxu1 }
 0x4de   :  { %v1326_v41 = vadd.f32 %v1250_v36, %v3627_v43  ;;  %v1328_v30 = vadd.f32 %v1321_v38, %v3629_v31  ;;  %v3635_v38 = vld [vmem:[#allocation27_spill] sm:$0xff] }
 0x4df   :  { %v1252_v34 = vpop.f32.mrf.mxu0  ;;  %v1323_v40 = vpop.f32.mrf.mxu1 }
 0x4e0   :  { %v1330_v33 = vmul.f32 0.5, %v1326_v41  ;;  %v1327_v39 = vadd.f32 %v1252_v34, %v3628_v32  ;;  %v1329_v28 = vadd.f32 %v1323_v40, %v3630_v42  ;;  %v3637_v40 = vld [vmem:[#allocation29_spill] sm:$0xff] }
 0x4e2   :  { %2026 = vtanh.f32 %v1330_v33  ;;  %v1334_v29 = vmul.f32 0.5, %v1327_v39  ;;  %v1339_v45 = vmul.f32 0.5, %v1329_v28  ;;  %v1350_v33 = vstv %s1969_s11  ;;  %v3636_v39 = vld [vmem:[#allocation28_spill] sm:$0xff] }
 0x4e3   :  { %vm1351_vm5 = vcmp.lt.s32.totalorder %v2632_v44, %v1350_v33  ;;  %v3642_v33 = vld [vmem:[#allocation34_spill] sm:$0xff] }
 0x4e4   :  { %2028 = vtanh.f32 %v1334_v29 }
 0x4e5   :  { %2030 = vtanh.f32 %v1328_v30 }
 0x4e6   :  { %2032 = vtanh.f32 %v1339_v45 }
 0x4ef   :  { %v2027_v46 = vpop.eup %2026 }
 0x4f0   :  { %v1332_v27 = vmul.f32 0.5, %v2027_v46 }
 0x4f1   :  { %v2029_v25 = vpop.eup %2028 }
 0x4f2   :  { %v1333_v36 = vadd.f32 0.5, %v1332_v27  ;;  %v1336_v43 = vmul.f32 0.5, %v2029_v25  ;;  %v2031_v41 = vpop.eup %2030  ;;  %v3634_v25 = vld [vmem:[#allocation26_spill] sm:$0xff] }
 0x4f3   :  { %v2033_v28 = vpop.eup %2032 }
 0x4f4   :  { %v1337_v24 = vadd.f32 0.5, %v1336_v43  ;;  %v1344_v32 = vmul.f32 %v2031_v41, %v1333_v36  ;;  %v1341_v30 = vmul.f32 0.5, %v2033_v28  ;;  %v3638_v36 = vld [vmem:[#allocation30_spill] sm:$0xff]  ;;  %v3639_v43 = vld [vmem:[#allocation31_spill] sm:$0xff]  ;;  %v3640_v41 = vld [vmem:[#allocation32_spill] sm:$0xff] }
 0x4f5   :  { %v3645_v28 = vld [vmem:[#allocation37_spill] sm:$0xff] }
 0x4f6   :  { %v1343_v31 = vmul.f32 %v1337_v24, %v3050_v37  ;;  %v1342_v46 = vadd.f32 0.5, %v1341_v30  ;;  %v3633_v24 = vld [vmem:[#allocation25_spill] sm:$0xff]  ;;  %v3646_v30 = vld [vmem:[#allocation38_spill] sm:$0xff] }
 0x4f8   :  { %v1345_v29 = vadd.f32 %v1344_v32, %v1343_v31  ;;  %v3641_v32 = vld [vmem:[#allocation33_spill] sm:$0xff]  ;;  %v3643_v31 = vld [vmem:[#allocation35_spill] sm:$0xff] }
 0x4fa   :  { %2034 = vtanh.f32 %v1345_v29  ;;  %v3194_v42 = vsel %vm1351_vm5, %v1345_v29, %v3050_v37  ;;  %v3631_v37 = vld [vmem:[#allocation23_spill] sm:$0xff]  ;;  %v3644_v29 = vld [vmem:[#allocation36_spill] sm:$0xff] }
 0x507   :  { %v2035_v34 = vpop.eup %2034 }
 0x508   :  { %v1347_v27 = vmul.f32 %v2035_v34, %v1342_v46  ;;  %v3647_v46 = vld [vmem:[#allocation39_spill] sm:$0xff]  ;;  %v3648_v34 = vld [vmem:[#allocation40_spill] sm:$0xff] }
 0x50a   :  { %1349 = vst [vmem:[#allocation12 + $0x20] sm:$0xff] %v1347_v27  ;;  %v3197_v45 = vsel %vm1351_vm5, %v1347_v27, %v3053_v54  ;;  %v3632_v54 = vld [vmem:[#allocation24_spill] sm:$0xff]  ;;  %v3649_v27 = vld [vmem:[#allocation41_spill] sm:$0xff] }
 0x50b   :  { %1428 = vmatmul.mubr.f32.vlgmr.msra.gmra.mxu0 %v3197_v45  ;;  %1499 = vmatmul.mubr.f32.vlgmr.msra.gmra.mxu1 %v3197_v45 }
 0x50c   :  { %1543 = vmatpush1.msra.mxu0 %v2917_v6  ;;  %1614 = vmatpush1.msra.mxu1 %v2920_v16 }
 0x50d   :  { %1544 = vmatprep.subr.mxu0 %v2923_v10  ;;  %1615 = vmatprep.subr.mxu1 %v2926_v26 }
 0x50e   :  { %1545 = vmatpush1.msra.mxu0 %v2929_v62  ;;  %1616 = vmatpush1.msra.mxu1 %v2932_v0 }
 0x50f   :  { %1546 = vmatprep.subr.mxu0 %v2935_v18  ;;  %1617 = vmatprep.subr.mxu1 %v2938_v12 }
 0x510   :  { %1547 = vmatpush1.msra.mxu0 %v2941_v7  ;;  %1618 = vmatpush1.msra.mxu1 %v2944_v8 }
 0x511   :  { %1548 = vmatprep.subr.mxu0 %v2947_v35  ;;  %1619 = vmatprep.subr.mxu1 %v2950_v5 }
 0x512   :  { %1549 = vmatpush1.msra.mxu0 %v2953_v15  ;;  %1620 = vmatpush1.msra.mxu1 %v2956_v9 }
 0x513   :  { %1550 = vmatprep.subr.mxu0 %v2959_v14  ;;  %1621 = vmatprep.subr.mxu1 %v2962_v17 }
 0x514   :  { %1551 = vmatpush1.msra.mxu0 %v2965_v3  ;;  %1622 = vmatpush1.msra.mxu1 %v2968_v4 }
 0x515   :  { %1552 = vmatprep.subr.mxu0 %v2971_v11  ;;  %1623 = vmatprep.subr.mxu1 %v2974_v53 }
 0x516   :  { %1553 = vmatpush1.msra.mxu0 %v3603_v47  ;;  %1624 = vmatpush1.msra.mxu1 %v3604_v19 }
 0x517   :  { %1554 = vmatprep.subr.mxu0 %v3605_v55  ;;  %1625 = vmatprep.subr.mxu1 %v3606_v56 }
 0x518   :  { %1555 = vmatpush1.msra.mxu0 %v2989_v51  ;;  %1626 = vmatpush1.msra.mxu1 %v2992_v52 }
 0x519   :  { %1556 = vmatprep.subr.mxu0 %v2995_v13  ;;  %1627 = vmatprep.subr.mxu1 %v2998_v48 }
 0x51a   :  { %1557 = vmatpush1.msra.mxu0 %v3001_v49  ;;  %1628 = vmatpush1.msra.mxu1 %v3004_v50 }
 0x51b   :  { %1558 = vmatprep.subr.mxu0 %v3087_v57  ;;  %1629 = vmatprep.subr.mxu1 %v3090_v58 }
 0x51c   :  { %1559 = vmatpush1.msra.mxu0 %v3093_v59  ;;  %1630 = vmatpush1.msra.mxu1 %v3096_v60 }
 0x51d   :  { %1560 = vmatprep.subr.mxu0 %v3099_v61  ;;  %1631 = vmatprep.subr.mxu1 %v3102_v63 }
 0x51e   :  { %1561 = vmatpush1.msra.mxu0 %v3105_v1  ;;  %1632 = vmatpush1.msra.mxu1 %v3108_v2 }
 0x51f   :  { %1562 = vmatprep.subr.mxu0 %v3111_v20  ;;  %1633 = vmatprep.subr.mxu1 %v3114_v21 }
 0x520   :  { %1563 = vmatpush1.msra.mxu0 %v3117_v22  ;;  %1634 = vmatpush1.msra.mxu1 %v3120_v23 }
 0x521   :  { %1564 = vmatprep.subr.mxu0 %v3631_v37  ;;  %1635 = vmatprep.subr.mxu1 %v3632_v54 }
 0x522   :  { %1565 = vmatpush1.msra.mxu0 %v3633_v24  ;;  %1636 = vmatpush1.msra.mxu1 %v3634_v25 }
 0x523   :  { %1566 = vmatprep.subr.mxu0 %v3635_v38  ;;  %1637 = vmatprep.subr.mxu1 %v3636_v39 }
 0x524   :  { %1567 = vmatpush1.msra.mxu0 %v3637_v40  ;;  %1638 = vmatpush1.msra.mxu1 %v3638_v36  ;;  %v3655_v40 = vld [vmem:[#allocation62_spill] sm:$0xff] }
 0x525   :  { %1568 = vmatprep.subr.mxu0 %v3639_v43  ;;  %1639 = vmatprep.subr.mxu1 %v3640_v41  ;;  %v3650_v43 = vmov 0.0   ;;  %v3651_v41 = vld [vmem:[#allocation42_spill] sm:$0xff] }
 0x526   :  { %1569 = vmatpush1.msra.mxu0 %v3641_v32  ;;  %1640 = vmatpush1.msra.mxu1 %v3642_v33  ;;  %v3652_v33 = vld [vmem:[#allocation21_spill] sm:$0xff] }
 0x527   :  { %1570 = vmatprep.subr.mxu0 %v3643_v31  ;;  %1641 = vmatprep.subr.mxu1 %v3644_v29  ;;  %v3653_v31 = vld [vmem:[#allocation22_spill] sm:$0xff] }
 0x528   :  { %1571 = vmatpush1.msra.mxu0 %v3645_v28  ;;  %1642 = vmatpush1.msra.mxu1 %v3646_v30  ;;  %v3654_v28 = vld [vmem:[#allocation60_spill] sm:$0xff] }
 0x529   :  { %1572 = vmatprep.subr.mxu0 %v3647_v46  ;;  %1643 = vmatprep.subr.mxu1 %v3648_v34 }
 0x52a   :  { %1573 = vmatpush1.msra.mxu0 %v3649_v27  ;;  %1606 = vmatprep.mubr.f32.mxu0 %v3650_v43  ;;  %v3656_v27 = vld [vmem:[#allocation61_spill] sm:$0xff] }
 0x52b   :  { %1644 = vmatpush1.msra.mxu1 %v3651_v41  ;;  %1677 = vmatprep.mubr.f32.mxu1 %v3650_v43  ;;  %v3657_v43 = vld [vmem:[#allocation63_spill] sm:$0xff] }
 0x52c   :  { %1721 = vmatprep.subr.mxu0 %v3652_v33  ;;  %1792 = vmatprep.subr.mxu1 %v3653_v31 }
 0x5cb   :  { %v1429_v29 = vpop.f32.mrf.mxu0  ;;  %v1500_v30 = vpop.f32.mrf.mxu1 }
 0x5cc   :  { %v1505_v32 = vadd.f32 %v1429_v29, %v3654_v28  ;;  %v1507_v39 = vadd.f32 %v1500_v30, %v3656_v27 }
 0x5cd   :  { %v1431_v36 = vpop.f32.mrf.mxu0  ;;  %v1502_v41 = vpop.f32.mrf.mxu1 }
 0x5ce   :  { %v1509_v46 = vmul.f32 0.5, %v1505_v32  ;;  %v1506_v34 = vadd.f32 %v1431_v36, %v3655_v40  ;;  %v1508_v25 = vadd.f32 %v1502_v41, %v3657_v43  ;;  %v1529_v36 = vstv %s1970_s12 }
 0x5cf   :  { %vm1530_vm6 = vcmp.lt.s32.totalorder %v2632_v44, %v1529_v36 }
 0x5d0   :  { %2036 = vtanh.f32 %v1509_v46  ;;  %v1513_v38 = vmul.f32 0.5, %v1506_v34  ;;  %v1518_v33 = vmul.f32 0.5, %v1508_v25 }
 0x5d2   :  { %2038 = vtanh.f32 %v1513_v38 }
 0x5d3   :  { %2040 = vtanh.f32 %v1507_v39 }
 0x5d4   :  { %2042 = vtanh.f32 %v1518_v33 }
 0x5dd   :  { %v2037_v31 = vpop.eup %2036 }
 0x5de   :  { %v1511_v24 = vmul.f32 0.5, %v2037_v31 }
 0x5df   :  { %v2039_v54 = vpop.eup %2038 }
 0x5e0   :  { %v1512_v29 = vadd.f32 0.5, %v1511_v24  ;;  %v1515_v28 = vmul.f32 0.5, %v2039_v54  ;;  %v2041_v32 = vpop.eup %2040 }
 0x5e1   :  { %v2043_v25 = vpop.eup %2042 }
 0x5e2   :  { %v1516_v37 = vadd.f32 0.5, %v1515_v28  ;;  %v1523_v40 = vmul.f32 %v2041_v32, %v1512_v29  ;;  %v1520_v43 = vmul.f32 0.5, %v2043_v25 }
 0x5e4   :  { %v1522_v30 = vmul.f32 %v1516_v37, %v3194_v42  ;;  %v1521_v41 = vadd.f32 0.5, %v1520_v43  ;;  %v1708_v37 = vstv %s1971_s13 }
 0x5e5   :  { %vm1709_vm7 = vcmp.lt.s32.totalorder %v2632_v44, %v1708_v37 }
 0x5e6   :  { %v1524_v38 = vadd.f32 %v1523_v40, %v1522_v30 }
 0x5e8   :  { %2044 = vtanh.f32 %v1524_v38  ;;  %v3274_v39 = vsel %vm1530_vm6, %v1524_v38, %v3194_v42  ;;  %v3683_v38 = vld [vmem:[#allocation68_spill] sm:$0xff] }
 0x5f5   :  { %v2045_v46 = vpop.eup %2044 }
 0x5f6   :  { %v1526_v24 = vmul.f32 %v2045_v46, %v1521_v41 }
 0x5f8   :  { %1528 = vst [vmem:[#allocation12 + $0x28] sm:$0xff] %v1526_v24  ;;  %v3277_v54 = vsel %vm1530_vm6, %v1526_v24, %v3197_v45  ;;  %v3684_v24 = vld [vmem:[#allocation70_spill] sm:$0xff] }
 0x5f9   :  { %1607 = vmatmul.mubr.f32.vlgmr.msra.gmra.mxu0 %v3277_v54  ;;  %1678 = vmatmul.mubr.f32.vlgmr.msra.gmra.mxu1 %v3277_v54 }
 0x5fa   :  { %1722 = vmatpush1.msra.mxu0 %v2917_v6  ;;  %1793 = vmatpush1.msra.mxu1 %v2920_v16  ;;  %v3658_v6 = vld [vmem:[#allocation23_spill] sm:$0xff]  ;;  %v3659_v16 = vld [vmem:[#allocation24_spill] sm:$0xff] }
 0x5fb   :  { %1723 = vmatprep.subr.mxu0 %v2923_v10  ;;  %1794 = vmatprep.subr.mxu1 %v2926_v26  ;;  %v3660_v10 = vld [vmem:[#allocation25_spill] sm:$0xff]  ;;  %v3661_v26 = vld [vmem:[#allocation26_spill] sm:$0xff] }
 0x5fc   :  { %1724 = vmatpush1.msra.mxu0 %v2929_v62  ;;  %1795 = vmatpush1.msra.mxu1 %v2932_v0  ;;  %v3662_v62 = vld [vmem:[#allocation27_spill] sm:$0xff]  ;;  %v3663_v0 = vld [vmem:[#allocation28_spill] sm:$0xff] }
 0x5fd   :  { %1725 = vmatprep.subr.mxu0 %v2935_v18  ;;  %1796 = vmatprep.subr.mxu1 %v2938_v12  ;;  %v3664_v18 = vld [vmem:[#allocation29_spill] sm:$0xff]  ;;  %v3665_v12 = vld [vmem:[#allocation30_spill] sm:$0xff] }
 0x5fe   :  { %1726 = vmatpush1.msra.mxu0 %v2941_v7  ;;  %1797 = vmatpush1.msra.mxu1 %v2944_v8  ;;  %v3666_v7 = vld [vmem:[#allocation31_spill] sm:$0xff]  ;;  %v3667_v8 = vld [vmem:[#allocation32_spill] sm:$0xff] }
 0x5ff   :  { %1727 = vmatprep.subr.mxu0 %v2947_v35  ;;  %1798 = vmatprep.subr.mxu1 %v2950_v5  ;;  %v3668_v35 = vld [vmem:[#allocation33_spill] sm:$0xff]  ;;  %v3669_v5 = vld [vmem:[#allocation34_spill] sm:$0xff] }
 0x600   :  { %1728 = vmatpush1.msra.mxu0 %v2953_v15  ;;  %1799 = vmatpush1.msra.mxu1 %v2956_v9  ;;  %v3670_v15 = vld [vmem:[#allocation35_spill] sm:$0xff]  ;;  %v3671_v9 = vld [vmem:[#allocation36_spill] sm:$0xff] }
 0x601   :  { %1729 = vmatprep.subr.mxu0 %v2959_v14  ;;  %1800 = vmatprep.subr.mxu1 %v2962_v17  ;;  %v3672_v14 = vld [vmem:[#allocation37_spill] sm:$0xff]  ;;  %v3673_v17 = vld [vmem:[#allocation38_spill] sm:$0xff] }
 0x602   :  { %1730 = vmatpush1.msra.mxu0 %v2965_v3  ;;  %1801 = vmatpush1.msra.mxu1 %v2968_v4  ;;  %v3674_v3 = vld [vmem:[#allocation39_spill] sm:$0xff]  ;;  %v3675_v4 = vld [vmem:[#allocation40_spill] sm:$0xff] }
 0x603   :  { %1731 = vmatprep.subr.mxu0 %v2971_v11  ;;  %1802 = vmatprep.subr.mxu1 %v2974_v53  ;;  %v3676_v11 = vld [vmem:[#allocation41_spill] sm:$0xff]  ;;  %v3677_v53 = vmov 0.0  }
 0x604   :  { %1732 = vmatpush1.msra.mxu0 %v3603_v47  ;;  %1803 = vmatpush1.msra.mxu1 %v3604_v19  ;;  %v3680_v19 = vld [vmem:[#allocation66_spill] sm:$0xff] }
 0x605   :  { %1733 = vmatprep.subr.mxu0 %v3605_v55  ;;  %1804 = vmatprep.subr.mxu1 %v3606_v56  ;;  %v3681_v56 = vld [vmem:[#allocation65_spill] sm:$0xff] }
 0x606   :  { %1734 = vmatpush1.msra.mxu0 %v2989_v51  ;;  %1805 = vmatpush1.msra.mxu1 %v2992_v52 }
 0x607   :  { %1735 = vmatprep.subr.mxu0 %v2995_v13  ;;  %1806 = vmatprep.subr.mxu1 %v2998_v48  ;;  %v3678_v13 = vld [vmem:[#allocation42_spill] sm:$0xff] }
 0x608   :  { %1736 = vmatpush1.msra.mxu0 %v3001_v49  ;;  %1807 = vmatpush1.msra.mxu1 %v3004_v50  ;;  %v3679_v49 = vld [vmem:[#allocation64_spill] sm:$0xff] }
 0x609   :  { %1737 = vmatprep.subr.mxu0 %v3087_v57  ;;  %1808 = vmatprep.subr.mxu1 %v3090_v58 }
 0x60a   :  { %1738 = vmatpush1.msra.mxu0 %v3093_v59  ;;  %1809 = vmatpush1.msra.mxu1 %v3096_v60  ;;  %v3682_v60 = vld [vmem:[#allocation67_spill] sm:$0xff] }
 0x60b   :  { %1739 = vmatprep.subr.mxu0 %v3099_v61  ;;  %1810 = vmatprep.subr.mxu1 %v3102_v63 }
 0x60c   :  { %1740 = vmatpush1.msra.mxu0 %v3105_v1  ;;  %1811 = vmatpush1.msra.mxu1 %v3108_v2 }
 0x60d   :  { %1741 = vmatprep.subr.mxu0 %v3111_v20  ;;  %1812 = vmatprep.subr.mxu1 %v3114_v21 }
 0x60e   :  { %1742 = vmatpush1.msra.mxu0 %v3117_v22  ;;  %1813 = vmatpush1.msra.mxu1 %v3120_v23 }
 0x60f   :  { %1743 = vmatprep.subr.mxu0 %v3658_v6  ;;  %1814 = vmatprep.subr.mxu1 %v3659_v16 }
 0x610   :  { %1744 = vmatpush1.msra.mxu0 %v3660_v10  ;;  %1815 = vmatpush1.msra.mxu1 %v3661_v26 }
 0x611   :  { %1745 = vmatprep.subr.mxu0 %v3662_v62  ;;  %1816 = vmatprep.subr.mxu1 %v3663_v0  ;;  %v3686_v62 = vld [vmem:[#allocation71_spill] sm:$0xff] }
 0x612   :  { %1746 = vmatpush1.msra.mxu0 %v3664_v18  ;;  %1817 = vmatpush1.msra.mxu1 %v3665_v12 }
 0x613   :  { %1747 = vmatprep.subr.mxu0 %v3666_v7  ;;  %1818 = vmatprep.subr.mxu1 %v3667_v8 }
 0x614   :  { %1748 = vmatpush1.msra.mxu0 %v3668_v35  ;;  %1819 = vmatpush1.msra.mxu1 %v3669_v5 }
 0x615   :  { %1749 = vmatprep.subr.mxu0 %v3670_v15  ;;  %1820 = vmatprep.subr.mxu1 %v3671_v9 }
 0x616   :  { %1750 = vmatpush1.msra.mxu0 %v3672_v14  ;;  %1821 = vmatpush1.msra.mxu1 %v3673_v17  ;;  %v1887_v14 = vstv %s1972_s14 }
 0x617   :  { %1751 = vmatprep.subr.mxu0 %v3674_v3  ;;  %1822 = vmatprep.subr.mxu1 %v3675_v4  ;;  %vm3358_vm8 = vcmp.lt.s32.totalorder %v2632_v44, %v1887_v14 }
 0x618   :  { %1752 = vmatpush1.msra.mxu0 %v3676_v11  ;;  %1785 = vmatprep.mubr.f32.mxu0 %v3677_v53 }
 0x619   :  { %1823 = vmatpush1.msra.mxu1 %v3678_v13  ;;  %1856 = vmatprep.mubr.f32.mxu1 %v3677_v53 }
 0x6b9   :  { %v1608_v48 = vpop.f32.mrf.mxu0  ;;  %v1679_v51 = vpop.f32.mrf.mxu1 }
 0x6ba   :  { %v1684_v50 = vadd.f32 %v1608_v48, %v3679_v49  ;;  %v1686_v57 = vadd.f32 %v1679_v51, %v3681_v56 }
 0x6bb   :  { %v1610_v52 = vpop.f32.mrf.mxu0  ;;  %v1681_v59 = vpop.f32.mrf.mxu1 }
 0x6bc   :  { %v1688_v47 = vmul.f32 0.5, %v1684_v50  ;;  %v1685_v55 = vadd.f32 %v1610_v52, %v3680_v19  ;;  %v1687_v61 = vadd.f32 %v1681_v59, %v3682_v60 }
 0x6be   :  { %2046 = vtanh.f32 %v1688_v47  ;;  %v1692_v58 = vmul.f32 0.5, %v1685_v55  ;;  %v1697_v63 = vmul.f32 0.5, %v1687_v61 }
 0x6c0   :  { %2048 = vtanh.f32 %v1692_v58 }
 0x6c1   :  { %2050 = vtanh.f32 %v1686_v57 }
 0x6c2   :  { %2052 = vtanh.f32 %v1697_v63 }
 0x6cb   :  { %v2047_v1 = vpop.eup %2046 }
 0x6cc   :  { %v1690_v2 = vmul.f32 0.5, %v2047_v1 }
 0x6cd   :  { %v2049_v20 = vpop.eup %2048 }
 0x6ce   :  { %v1691_v21 = vadd.f32 0.5, %v1690_v2  ;;  %v1694_v22 = vmul.f32 0.5, %v2049_v20  ;;  %v2051_v23 = vpop.eup %2050 }
 0x6cf   :  { %v2053_v31 = vpop.eup %2052 }
 0x6d0   :  { %v1695_v42 = vadd.f32 0.5, %v1694_v22  ;;  %v1702_v45 = vmul.f32 %v2051_v23, %v1691_v21  ;;  %v1699_v29 = vmul.f32 0.5, %v2053_v31 }
 0x6d2   :  { %v1701_v34 = vmul.f32 %v1695_v42, %v3274_v39  ;;  %v1700_v28 = vadd.f32 0.5, %v1699_v29 }
 0x6d4   :  { %v1703_v27 = vadd.f32 %v1702_v45, %v1701_v34 }
 0x6d6   :  { %2054 = vtanh.f32 %v1703_v27  ;;  %v1711_v33 = vsel %vm1709_vm7, %v1703_v27, %v3274_v39  ;;  %v3685_v39 = vld [vmem:[#allocation69_spill] sm:$0xff] }
 0x6e3   :  { %v2055_v32 = vpop.eup %2054 }
 0x6e4   :  { %v1705_v40 = vmul.f32 %v2055_v32, %v1700_v28 }
 0x6e6   :  { %1707 = vst [vmem:[#allocation12 + $0x30] sm:$0xff] %v1705_v40  ;;  %v1710_v36 = vsel %vm1709_vm7, %v1705_v40, %v3277_v54 }
 0x6e7   :  { %1786 = vmatmul.mubr.f32.vlgmr.msra.gmra.mxu0 %v1710_v36  ;;  %1857 = vmatmul.mubr.f32.vlgmr.msra.gmra.mxu1 %v1710_v36 }
 0x7a7   :  { %v1787_v30 = vpop.f32.mrf.mxu0  ;;  %v1858_v43 = vpop.f32.mrf.mxu1 }
 0x7a8   :  { %v1863_v25 = vadd.f32 %v1787_v30, %v3683_v38  ;;  %v1865_v16 = vadd.f32 %v1858_v43, %v3685_v39 }
 0x7a9   :  { %v1789_v41 = vpop.f32.mrf.mxu0  ;;  %v1860_v26 = vpop.f32.mrf.mxu1 }
 0x7aa   :  { %v1867_v46 = vmul.f32 0.5, %v1863_v25  ;;  %v1864_v6 = vadd.f32 %v1789_v41, %v3684_v24  ;;  %v1866_v0 = vadd.f32 %v1860_v26, %v3686_v62 }
 0x7ac   :  { %2056 = vtanh.f32 %v1867_v46  ;;  %v1871_v10 = vmul.f32 0.5, %v1864_v6  ;;  %v1876_v54 = vmul.f32 0.5, %v1866_v0 }
 0x7ae   :  { %2058 = vtanh.f32 %v1871_v10 }
 0x7af   :  { %2060 = vtanh.f32 %v1865_v16 }
 0x7b0   :  { %2062 = vtanh.f32 %v1876_v54 }
 0x7b9   :  { %v2057_v18 = vpop.eup %2056 }
 0x7ba   :  { %v1869_v12 = vmul.f32 0.5, %v2057_v18 }
 0x7bb   :  { %v2059_v7 = vpop.eup %2058 }
 0x7bc   :  { %v1870_v8 = vadd.f32 0.5, %v1869_v12  ;;  %v1873_v35 = vmul.f32 0.5, %v2059_v7  ;;  %v2061_v5 = vpop.eup %2060 }
 0x7bd   :  { %v2063_v53 = vpop.eup %2062 }
 0x7be   :  { %v1874_v15 = vadd.f32 0.5, %v1873_v35  ;;  %v1881_v9 = vmul.f32 %v2061_v5, %v1870_v8  ;;  %v1878_v13 = vmul.f32 0.5, %v2063_v53 }
 0x7c0   :  { %v1880_v17 = vmul.f32 %v1874_v15, %v1711_v33  ;;  %v1879_v48 = vadd.f32 0.5, %v1878_v13 }
 0x7c2   :  { %v1882_v4 = vadd.f32 %v1881_v9, %v1880_v17 }
 0x7c4   :  { %2064 = vtanh.f32 %v1882_v4  ;;  %v1890_v11 = vsel %vm3358_vm8, %v1882_v4, %v1711_v33 }
 0x7c5   :  { %1897 = vst [vmem:[#allocation15] sm:$0xff] %v1890_v11 }
 0x7d1   :  { %v2065_v49 = vpop.eup %2064 }
 0x7d2   :  { %v1884_v44 = vmul.f32 %v2065_v49, %v1879_v48 }
 0x7d4   :  { %1886 = vst [vmem:[#allocation12 + $0x38] sm:$0xff] %v1884_v44  ;;  %v1889_v50 = vsel %vm3358_vm8, %v1884_v44, %v1710_v36 }
 0x7d5   :  { %1896 = vst [vmem:[#allocation13] sm:$0xff] %v1889_v50 }
 0x7d6   :  { %2193 = shalt.err (!%p2190_p5)
}
 0x7d7   :  { %s2261_s20 = smov 128   ;;  %s2262_s21 = smov 8  }
 0x7d8   :  { %1909 = dma.vmem_to_hbm [thread:$0]  %s1904_s16, 1024, %s3380_s5, [#allocation9], %s2261_s20, %s2261_s20, %s2262_s21  }
 0x7d9   :  { %s2202_s24 = scalar_lea.vmem %s1917_s3, 128  ;;  %p2207_p7 = scmp.lt.s32.totalorder %s1917_s3, %s1917_s3 }
 0x7da   :  { %p2203_p6 = scmp.ne.s32.totalorder %s1917_s3, %s2202_s24  ;;  %p2208_p8 = scmp.lt.s32.totalorder %s2202_s24, %s2202_s24 }
 0x7dc   :  { %p2209_p9 = por %p2208_p8, %p2207_p7 }
 0x7de   :  { %p2210_p10 = pnand %p2209_p9, %p2203_p6 }
 0x7e0   :  { %2213 = shalt.err (!%p2210_p10)
}
 0x7e1   :  { %1919 = dma.vmem_to_hbm [thread:$0]  %s1917_s3, 128, %s3381_s6, [#allocation14]  }
 0x7e2   :  { %s2222_s27 = scalar_lea.vmem %s1927_s18, 128  ;;  %p2227_p12 = scmp.lt.s32.totalorder %s1927_s18, %s1927_s18 }
 0x7e3   :  { %p2223_p11 = scmp.ne.s32.totalorder %s1927_s18, %s2222_s27  ;;  %p2228_p13 = scmp.lt.s32.totalorder %s2222_s27, %s2222_s27 }
 0x7e5   :  { %p2229_p0 = por %p2228_p13, %p2227_p12 }
 0x7e7   :  { %p2230_p1 = pnand %p2229_p0, %p2223_p11 }
 0x7e9   :  { %2233 = shalt.err (!%p2230_p1)
}
 0x7ea   :  { %1929 = dma.vmem_to_hbm [thread:$0]  %s1927_s18, 128, %s3382_s7, [#allocation14]  }
 0x7eb   :  { %2248 = dma.done.wait [#allocation9], 1024  }
 0x7ec   :  { %2249 = vsyncadd [#allocation9], 4294966272 }
 0x7ed   :  { %2250 = dma.done.wait [#allocation14], 256  }
 0x7ee   :  { %2251 = vsyncadd [#allocation14], 4294967040 }
 0x7ef   :  { %1939 = vsyncpa [#allocation8], 1 }
 0x7f0   :  { %1940 = vsyncpa [#allocation11], 1 }
 0x7f1   :  { %1941 = vsyncpa [#allocation9], 1 }
 0x7f2   :  { %1942 = vsyncpa [#allocation14], 1 }

</bundles_post_ra>
